<compile_context>
chip_gen: v5e
topology: v5e:2x2
jax: 0.10.0
libtpu: 0.0.40
codegen_flags: <defaults>
</compile_context>

<pallas_src>
import jax
import jax.numpy as jnp
from jax import lax
from jax.experimental import pallas as pl
from jax.experimental.pallas import tpu as pltpu

NUM_HISTORY = 4     # stand-in for args.num_history
NUM_ACTIONS = 4
SEQ_LEN = 37        # 37 -> 17 -> 7 -> 2 under three (k=5, s=2) valid convs; 16*2 = 32 = fc1 in_features
BATCH = 2
KSIZE = 5
STRIDE = 2
CONV_CH = 16
FC_HIDDEN = 32
BN_EPS = 1e-5


def _conv_out_len(l):
    return (l - KSIZE) // STRIDE + 1


L1 = _conv_out_len(SEQ_LEN)   # 17
L2 = _conv_out_len(L1)        # 7
L3 = _conv_out_len(L2)        # 2
assert CONV_CH * L3 == FC_HIDDEN, (L3, CONV_CH, FC_HIDDEN)


# ----------------------------- Pallas kernel ------------------------------ #

def _row_select_matrix(lout, t):
    """(lout, t) 0/1 matrix picking rows 0, STRIDE, 2*STRIDE, ... (stride-2 downsample as a matmul)."""
    r = lax.broadcasted_iota(jnp.int32, (lout, t), 0)
    c = lax.broadcasted_iota(jnp.int32, (lout, t), 1)
    return (c == STRIDE * r).astype(jnp.float32)


def _dqn_kernel(x_ref,
                w1_ref, b1_ref, w2_ref, b2_ref, w3_ref, b3_ref,
                fw1_ref, fb1_ref, fw2_ref, fb2_ref, fw3_ref, fb3_ref,
                o_ref):
    """Whole DQN forward on one VMEM-resident block.

    x_ref:  (B, SEQ_LEN, NUM_HISTORY)         channels-last input
    wN_ref: (K, Cin, Cout)                    conv weights with BN scale folded in
    bN_ref: (1, Cout)                         folded conv+BN bias
    fwN:    (in, out) FC weights (fc1 pre-permuted for channels-last flatten)
    fbN:    (1, out)  FC biases
    o_ref:  (B, NUM_ACTIONS)
    """
    # stride-2 selection matrices, shared across the batch loop
    sel1 = _row_select_matrix(L1, SEQ_LEN - KSIZE + 1)
    sel2 = _row_select_matrix(L2, L1 - KSIZE + 1)
    sel3 = _row_select_matrix(L3, L2 - KSIZE + 1)

    def conv_bn_relu(a, w_ref, b_ref, sel, t):
        # Conv1d(valid, stride=2) as a sum of K shifted unit-stride matmuls
        # followed by a 0/1 selection matmul (no strided slices / gathers).
        y = jnp.dot(a[0:t, :], w_ref[0], preferred_element_type=jnp.float32)
        for k in range(1, KSIZE):
            y = y + jnp.dot(a[k:k + t, :], w_ref[k],
                            preferred_element_type=jnp.float32)
        y = jnp.dot(sel, y, preferred_element_type=jnp.float32)
        return jnp.maximum(y + b_ref[...], 0.0)

    outs = []
    for b in range(BATCH):
        a = x_ref[b]                                                        # (SEQ_LEN, Cin)
        a = conv_bn_relu(a, w1_ref, b1_ref, sel1, SEQ_LEN - KSIZE + 1)      # (L1, 16)
        a = conv_bn_relu(a, w2_ref, b2_ref, sel2, L1 - KSIZE + 1)           # (L2, 16)
        a = conv_bn_relu(a, w3_ref, b3_ref, sel3, L2 - KSIZE + 1)           # (L3, 16)

        # fc1 over the PyTorch NCW flatten: the fc1 weight rows were permuted in
        # the wrapper so we can consume our (l, c) layout row-block by row-block
        # (no in-kernel reshape / transpose needed).
        h = fb1_ref[...]
        for l in range(L3):
            h = h + jnp.dot(a[l:l + 1, :],
                            fw1_ref[l * CONV_CH:(l + 1) * CONV_CH, :],
                            preferred_element_type=jnp.float32)
        h = jnp.maximum(h, 0.0)                                             # (1, 32)
        h = jnp.maximum(jnp.dot(h, fw2_ref[...],
                                preferred_element_type=jnp.float32)
                        + fb2_ref[...], 0.0)                                # (1, 32)
        outs.append(jnp.dot(h, fw3_ref[...],
                            preferred_element_type=jnp.float32)
                    + fb3_ref[...])                                         # (1, 4)

    o_ref[...] = jnp.concatenate(outs, axis=0).astype(o_ref.dtype)


# ------------------------------- wrapper ----------------------------------- #

def dqn_forward(params, x):
    f32 = jnp.float32

    def fold_conv(w, b, bn):
        gamma, beta, mean, var = bn
        scale = gamma / jnp.sqrt(var + BN_EPS)                      # (Cout,)
        shift = beta + (b - mean) * scale                           # conv bias + BN folded
        wm = jnp.transpose(w, (2, 1, 0)) * scale[None, None, :]     # (K, Cin, Cout), BN-scaled
        return wm.astype(f32), shift.reshape(1, -1).astype(f32)

    w1, s1 = fold_conv(params["w1"], params["b1"], params["bn1"])
    w2, s2 = fold_conv(params["w2"], params["b2"], params["bn2"])
    w3, s3 = fold_conv(params["w3"], params["b3"], params["bn3"])

    # fc1 consumes the PyTorch NCW flatten (index = c*L3 + l); the kernel produces a
    # channels-last (l, c) activation, so permute fc1's input dimension here.
    j = jnp.arange(CONV_CH * L3)
    perm = (j % CONV_CH) * L3 + (j // CONV_CH)          # ours[l*16 + c] <- torch[c*L3 + l]
    fw1 = params["fw1"].T[perm, :].astype(f32)          # (32, 32)  (in_ours, out)
    fw2 = params["fw2"].T.astype(f32)                   # (32, 32)  (in, out)
    fw3 = params["fw3"].T.astype(f32)                   # (32, 4)   (in, out)
    fb1 = params["fb1"].reshape(1, -1).astype(f32)
    fb2 = params["fb2"].reshape(1, -1).astype(f32)
    fb3 = params["fb3"].reshape(1, -1).astype(f32)

    x_cl = jnp.transpose(x, (0, 2, 1)).astype(f32)      # (B, L, C) channels-last

    vmem = pl.BlockSpec(memory_space=pltpu.MemorySpace.VMEM)
    return pl.pallas_call(
        _dqn_kernel,
        out_shape=jax.ShapeDtypeStruct((BATCH, NUM_ACTIONS), f32),
        in_specs=[vmem] * 13,
        out_specs=vmem,
    )(x_cl, w1, s1, w2, s2, w3, s3, fw1, fb1, fw2, fb2, fw3, fb3)


# ------------------------- deterministic parameters ------------------------ #

def init_params(key):
    ks = jax.random.split(key, 24)

    def u(k, shape, lo, hi):
        return jax.random.uniform(k, shape, jnp.float32, lo, hi)

    def bn_stats(k):
        k1, k2, k3, k4 = jax.random.split(k, 4)
        gamma = u(k1, (16,), 0.5, 1.5)
        beta = u(k2, (16,), -0.1, 0.1)
        mean = u(k3, (16,), -0.1, 0.1)
        var = u(k4, (16,), 0.5, 1.5)
        return (gamma, beta, mean, var)

    return {
        "w1": u(ks[0], (16, NUM_HISTORY, 5), -0.1, 0.1),
        "b1": u(ks[1], (16,), -0.1, 0.1),
        "bn1": bn_stats(ks[2]),
        "w2": u(ks[3], (16, 16, 5), -0.1, 0.1),
        "b2": u(ks[4], (16,), -0.1, 0.1),
        "bn2": bn_stats(ks[5]),
        "w3": u(ks[6], (16, 16, 5), -0.1, 0.1),
        "b3": u(ks[7], (16,), -0.1, 0.1),
        "bn3": bn_stats(ks[8]),
        "fw1": u(ks[9], (32, 32), -0.1, 0.1),
        "fb1": u(ks[10], (32,), -0.1, 0.1),
        "fw2": u(ks[11], (32, 32), -0.1, 0.1),
        "fb2": u(ks[12], (32,), -0.1, 0.1),
        "fw3": u(ks[13], (NUM_ACTIONS, 32), -0.1, 0.1),
        "fb3": u(ks[14], (NUM_ACTIONS,), -0.1, 0.1),
    }


# ------------------------------ pure-JAX ref -------------------------------- #

def reference_forward(params, x):
    def conv(x, w, b):
        y = jax.lax.conv_general_dilated(
            x, w, window_strides=(2,), padding="VALID",
            dimension_numbers=("NCH", "OIH", "NCH"))
        return y + b[None, :, None]

    def bn(x, stats):
        g, be, m, v = stats
        return (x - m[None, :, None]) * (g / jnp.sqrt(v + BN_EPS))[None, :, None] + be[None, :, None]

    x = jax.nn.relu(bn(conv(x, params["w1"], params["b1"]), params["bn1"]))
    x = jax.nn.relu(bn(conv(x, params["w2"], params["b2"]), params["bn2"]))
    x = jax.nn.relu(bn(conv(x, params["w3"], params["b3"]), params["bn3"]))
    x = x.reshape(x.shape[0], -1)
    x = jax.nn.relu(x @ params["fw1"].T + params["fb1"])
    x = jax.nn.relu(x @ params["fw2"].T + params["fb2"])
    return x @ params["fw3"].T + params["fb3"]


if __name__ == "__main__":
    key = jax.random.PRNGKey(0)
    pkey, xkey = jax.random.split(key)
    params = init_params(pkey)
    x = jax.random.normal(xkey, (BATCH, NUM_HISTORY, SEQ_LEN), jnp.float32)

    out = jax.jit(dqn_forward)(params, x)
    out = jax.block_until_ready(out)

    ref = jax.block_until_ready(reference_forward(params, x))
    assert out.shape == (BATCH, NUM_ACTIONS), out.shape
    assert jnp.allclose(out, ref, atol=1e-2, rtol=1e-2), (out, ref)

    print("KERNEL_OK")
</pallas_src>

<mosaic_0001>
module attributes {stable_mosaic.version = 11 : i64} {
  func.func @_dqn_kernel(%arg0: memref<2x37x4xf32, #tpu.memory_space<vmem>>, %arg1: memref<5x4x16xf32, #tpu.memory_space<vmem>>, %arg2: memref<1x16xf32, #tpu.memory_space<vmem>>, %arg3: memref<5x16x16xf32, #tpu.memory_space<vmem>>, %arg4: memref<1x16xf32, #tpu.memory_space<vmem>>, %arg5: memref<5x16x16xf32, #tpu.memory_space<vmem>>, %arg6: memref<1x16xf32, #tpu.memory_space<vmem>>, %arg7: memref<32x32xf32, #tpu.memory_space<vmem>>, %arg8: memref<1x32xf32, #tpu.memory_space<vmem>>, %arg9: memref<32x32xf32, #tpu.memory_space<vmem>>, %arg10: memref<1x32xf32, #tpu.memory_space<vmem>>, %arg11: memref<32x4xf32, #tpu.memory_space<vmem>>, %arg12: memref<1x4xf32, #tpu.memory_space<vmem>>, %arg13: memref<2x4xf32, #tpu.memory_space<vmem>>) attributes {dimension_semantics = [], scalar_prefetch = 0 : i64, scratch_operands = 0 : i64, tpu.core_type = #tpu.core_type<tc>} {
    %0 = tpu.iota {dimensions = array<i32: 0>} : vector<17x33xi32>
    %1 = tpu.iota {dimensions = array<i32: 1>} : vector<17x33xi32>
    %c2_i32 = arith.constant 2 : i32
    %2 = vector.broadcast %c2_i32 : i32 to vector<17x33xi32>
    %3 = arith.muli %2, %0 : vector<17x33xi32>
    %4 = arith.cmpi eq, %1, %3 : vector<17x33xi32>
    %5 = arith.extui %4 : vector<17x33xi1> to vector<17x33xi32>
    %6 = arith.sitofp %5 : vector<17x33xi32> to vector<17x33xf32>
    %7 = tpu.iota {dimensions = array<i32: 0>} : vector<7x13xi32>
    %8 = tpu.iota {dimensions = array<i32: 1>} : vector<7x13xi32>
    %c2_i32_0 = arith.constant 2 : i32
    %9 = vector.broadcast %c2_i32_0 : i32 to vector<7x13xi32>
    %10 = arith.muli %9, %7 : vector<7x13xi32>
    %11 = arith.cmpi eq, %8, %10 : vector<7x13xi32>
    %12 = arith.extui %11 : vector<7x13xi1> to vector<7x13xi32>
    %13 = arith.sitofp %12 : vector<7x13xi32> to vector<7x13xf32>
    %14 = tpu.iota {dimensions = array<i32: 0>} : vector<2x3xi32>
    %15 = tpu.iota {dimensions = array<i32: 1>} : vector<2x3xi32>
    %c2_i32_1 = arith.constant 2 : i32
    %16 = vector.broadcast %c2_i32_1 : i32 to vector<2x3xi32>
    %17 = arith.muli %16, %14 : vector<2x3xi32>
    %18 = arith.cmpi eq, %15, %17 : vector<2x3xi32>
    %19 = arith.extui %18 : vector<2x3xi1> to vector<2x3xi32>
    %20 = arith.sitofp %19 : vector<2x3xi32> to vector<2x3xf32>
    %c0 = arith.constant 0 : index
    %c0_2 = arith.constant 0 : index
    %c0_3 = arith.constant 0 : index
    %21 = vector.load %arg0[%c0, %c0_2, %c0_3] : memref<2x37x4xf32, #tpu.memory_space<vmem>>, vector<1x37x4xf32>
    %22 = vector.shape_cast %21 : vector<1x37x4xf32> to vector<37x4xf32>
    %23 = vector.extract_strided_slice %22 {offsets = [0, 0], sizes = [33, 4], strides = [1, 1]} : vector<37x4xf32> to vector<33x4xf32>
    %c0_4 = arith.constant 0 : index
    %c0_5 = arith.constant 0 : index
    %c0_6 = arith.constant 0 : index
    %24 = vector.load %arg1[%c0_4, %c0_5, %c0_6] : memref<5x4x16xf32, #tpu.memory_space<vmem>>, vector<1x4x16xf32>
    %25 = vector.shape_cast %24 : vector<1x4x16xf32> to vector<4x16xf32>
    %cst = arith.constant dense<0.000000e+00> : vector<33x16xf32>
    %26 = tpu.matmul %23, %25, %cst {dimension_numbers = #tpu.dot_dimension_numbers<[1], [0], [0], [1], [0, 0, 1, 1], [], []>} : vector<33x4xf32>, vector<4x16xf32>, vector<33x16xf32> -> vector<33x16xf32>
    %27 = vector.extract_strided_slice %22 {offsets = [1, 0], sizes = [33, 4], strides = [1, 1]} : vector<37x4xf32> to vector<33x4xf32>
    %c1 = arith.constant 1 : index
    %c0_7 = arith.constant 0 : index
    %c0_8 = arith.constant 0 : index
    %28 = vector.load %arg1[%c1, %c0_7, %c0_8] : memref<5x4x16xf32, #tpu.memory_space<vmem>>, vector<1x4x16xf32>
    %29 = vector.shape_cast %28 : vector<1x4x16xf32> to vector<4x16xf32>
    %cst_9 = arith.constant dense<0.000000e+00> : vector<33x16xf32>
    %30 = tpu.matmul %27, %29, %cst_9 {dimension_numbers = #tpu.dot_dimension_numbers<[1], [0], [0], [1], [0, 0, 1, 1], [], []>} : vector<33x4xf32>, vector<4x16xf32>, vector<33x16xf32> -> vector<33x16xf32>
    %31 = arith.addf %26, %30 : vector<33x16xf32>
    %32 = vector.extract_strided_slice %22 {offsets = [2, 0], sizes = [33, 4], strides = [1, 1]} : vector<37x4xf32> to vector<33x4xf32>
    %c2 = arith.constant 2 : index
    %c0_10 = arith.constant 0 : index
    %c0_11 = arith.constant 0 : index
    %33 = vector.load %arg1[%c2, %c0_10, %c0_11] : memref<5x4x16xf32, #tpu.memory_space<vmem>>, vector<1x4x16xf32>
    %34 = vector.shape_cast %33 : vector<1x4x16xf32> to vector<4x16xf32>
    %cst_12 = arith.constant dense<0.000000e+00> : vector<33x16xf32>
    %35 = tpu.matmul %32, %34, %cst_12 {dimension_numbers = #tpu.dot_dimension_numbers<[1], [0], [0], [1], [0, 0, 1, 1], [], []>} : vector<33x4xf32>, vector<4x16xf32>, vector<33x16xf32> -> vector<33x16xf32>
    %36 = arith.addf %31, %35 : vector<33x16xf32>
    %37 = vector.extract_strided_slice %22 {offsets = [3, 0], sizes = [33, 4], strides = [1, 1]} : vector<37x4xf32> to vector<33x4xf32>
    %c3 = arith.constant 3 : index
    %c0_13 = arith.constant 0 : index
    %c0_14 = arith.constant 0 : index
    %38 = vector.load %arg1[%c3, %c0_13, %c0_14] : memref<5x4x16xf32, #tpu.memory_space<vmem>>, vector<1x4x16xf32>
    %39 = vector.shape_cast %38 : vector<1x4x16xf32> to vector<4x16xf32>
    %cst_15 = arith.constant dense<0.000000e+00> : vector<33x16xf32>
    %40 = tpu.matmul %37, %39, %cst_15 {dimension_numbers = #tpu.dot_dimension_numbers<[1], [0], [0], [1], [0, 0, 1, 1], [], []>} : vector<33x4xf32>, vector<4x16xf32>, vector<33x16xf32> -> vector<33x16xf32>
    %41 = arith.addf %36, %40 : vector<33x16xf32>
    %42 = vector.extract_strided_slice %22 {offsets = [4, 0], sizes = [33, 4], strides = [1, 1]} : vector<37x4xf32> to vector<33x4xf32>
    %c4 = arith.constant 4 : index
    %c0_16 = arith.constant 0 : index
    %c0_17 = arith.constant 0 : index
    %43 = vector.load %arg1[%c4, %c0_16, %c0_17] : memref<5x4x16xf32, #tpu.memory_space<vmem>>, vector<1x4x16xf32>
    %44 = vector.shape_cast %43 : vector<1x4x16xf32> to vector<4x16xf32>
    %cst_18 = arith.constant dense<0.000000e+00> : vector<33x16xf32>
    %45 = tpu.matmul %42, %44, %cst_18 {dimension_numbers = #tpu.dot_dimension_numbers<[1], [0], [0], [1], [0, 0, 1, 1], [], []>} : vector<33x4xf32>, vector<4x16xf32>, vector<33x16xf32> -> vector<33x16xf32>
    %46 = arith.addf %41, %45 : vector<33x16xf32>
    %cst_19 = arith.constant dense<0.000000e+00> : vector<17x16xf32>
    %47 = tpu.matmul %6, %46, %cst_19 {dimension_numbers = #tpu.dot_dimension_numbers<[1], [0], [0], [1], [0, 0, 1, 1], [], []>} : vector<17x33xf32>, vector<33x16xf32>, vector<17x16xf32> -> vector<17x16xf32>
    %c0_20 = arith.constant 0 : index
    %c0_21 = arith.constant 0 : index
    %48 = vector.load %arg2[%c0_20, %c0_21] : memref<1x16xf32, #tpu.memory_space<vmem>>, vector<1x16xf32>
    %49 = vector.broadcast %48 : vector<1x16xf32> to vector<17x16xf32>
    %50 = arith.addf %47, %49 : vector<17x16xf32>
    %cst_22 = arith.constant 0.000000e+00 : f32
    %51 = vector.broadcast %cst_22 : f32 to vector<17x16xf32>
    %52 = arith.maximumf %50, %51 : vector<17x16xf32>
    %53 = vector.extract_strided_slice %52 {offsets = [0, 0], sizes = [13, 16], strides = [1, 1]} : vector<17x16xf32> to vector<13x16xf32>
    %c0_23 = arith.constant 0 : index
    %c0_24 = arith.constant 0 : index
    %c0_25 = arith.constant 0 : index
    %54 = vector.load %arg3[%c0_23, %c0_24, %c0_25] : memref<5x16x16xf32, #tpu.memory_space<vmem>>, vector<1x16x16xf32>
    %55 = vector.shape_cast %54 : vector<1x16x16xf32> to vector<16x16xf32>
    %cst_26 = arith.constant dense<0.000000e+00> : vector<13x16xf32>
    %56 = tpu.matmul %53, %55, %cst_26 {dimension_numbers = #tpu.dot_dimension_numbers<[1], [0], [0], [1], [0, 0, 1, 1], [], []>} : vector<13x16xf32>, vector<16x16xf32>, vector<13x16xf32> -> vector<13x16xf32>
    %57 = vector.extract_strided_slice %52 {offsets = [1, 0], sizes = [13, 16], strides = [1, 1]} : vector<17x16xf32> to vector<13x16xf32>
    %c1_27 = arith.constant 1 : index
    %c0_28 = arith.constant 0 : index
    %c0_29 = arith.constant 0 : index
    %58 = vector.load %arg3[%c1_27, %c0_28, %c0_29] : memref<5x16x16xf32, #tpu.memory_space<vmem>>, vector<1x16x16xf32>
    %59 = vector.shape_cast %58 : vector<1x16x16xf32> to vector<16x16xf32>
    %cst_30 = arith.constant dense<0.000000e+00> : vector<13x16xf32>
    %60 = tpu.matmul %57, %59, %cst_30 {dimension_numbers = #tpu.dot_dimension_numbers<[1], [0], [0], [1], [0, 0, 1, 1], [], []>} : vector<13x16xf32>, vector<16x16xf32>, vector<13x16xf32> -> vector<13x16xf32>
    %61 = arith.addf %56, %60 : vector<13x16xf32>
    %62 = vector.extract_strided_slice %52 {offsets = [2, 0], sizes = [13, 16], strides = [1, 1]} : vector<17x16xf32> to vector<13x16xf32>
    %c2_31 = arith.constant 2 : index
    %c0_32 = arith.constant 0 : index
    %c0_33 = arith.constant 0 : index
    %63 = vector.load %arg3[%c2_31, %c0_32, %c0_33] : memref<5x16x16xf32, #tpu.memory_space<vmem>>, vector<1x16x16xf32>
    %64 = vector.shape_cast %63 : vector<1x16x16xf32> to vector<16x16xf32>
    %cst_34 = arith.constant dense<0.000000e+00> : vector<13x16xf32>
    %65 = tpu.matmul %62, %64, %cst_34 {dimension_numbers = #tpu.dot_dimension_numbers<[1], [0], [0], [1], [0, 0, 1, 1], [], []>} : vector<13x16xf32>, vector<16x16xf32>, vector<13x16xf32> -> vector<13x16xf32>
    %66 = arith.addf %61, %65 : vector<13x16xf32>
    %67 = vector.extract_strided_slice %52 {offsets = [3, 0], sizes = [13, 16], strides = [1, 1]} : vector<17x16xf32> to vector<13x16xf32>
    %c3_35 = arith.constant 3 : index
    %c0_36 = arith.constant 0 : index
    %c0_37 = arith.constant 0 : index
    %68 = vector.load %arg3[%c3_35, %c0_36, %c0_37] : memref<5x16x16xf32, #tpu.memory_space<vmem>>, vector<1x16x16xf32>
    %69 = vector.shape_cast %68 : vector<1x16x16xf32> to vector<16x16xf32>
    %cst_38 = arith.constant dense<0.000000e+00> : vector<13x16xf32>
    %70 = tpu.matmul %67, %69, %cst_38 {dimension_numbers = #tpu.dot_dimension_numbers<[1], [0], [0], [1], [0, 0, 1, 1], [], []>} : vector<13x16xf32>, vector<16x16xf32>, vector<13x16xf32> -> vector<13x16xf32>
    %71 = arith.addf %66, %70 : vector<13x16xf32>
    %72 = vector.extract_strided_slice %52 {offsets = [4, 0], sizes = [13, 16], strides = [1, 1]} : vector<17x16xf32> to vector<13x16xf32>
    %c4_39 = arith.constant 4 : index
    %c0_40 = arith.constant 0 : index
    %c0_41 = arith.constant 0 : index
    %73 = vector.load %arg3[%c4_39, %c0_40, %c0_41] : memref<5x16x16xf32, #tpu.memory_space<vmem>>, vector<1x16x16xf32>
    %74 = vector.shape_cast %73 : vector<1x16x16xf32> to vector<16x16xf32>
    %cst_42 = arith.constant dense<0.000000e+00> : vector<13x16xf32>
    %75 = tpu.matmul %72, %74, %cst_42 {dimension_numbers = #tpu.dot_dimension_numbers<[1], [0], [0], [1], [0, 0, 1, 1], [], []>} : vector<13x16xf32>, vector<16x16xf32>, vector<13x16xf32> -> vector<13x16xf32>
    %76 = arith.addf %71, %75 : vector<13x16xf32>
    %cst_43 = arith.constant dense<0.000000e+00> : vector<7x16xf32>
    %77 = tpu.matmul %13, %76, %cst_43 {dimension_numbers = #tpu.dot_dimension_numbers<[1], [0], [0], [1], [0, 0, 1, 1], [], []>} : vector<7x13xf32>, vector<13x16xf32>, vector<7x16xf32> -> vector<7x16xf32>
    %c0_44 = arith.constant 0 : index
    %c0_45 = arith.constant 0 : index
    %78 = vector.load %arg4[%c0_44, %c0_45] : memref<1x16xf32, #tpu.memory_space<vmem>>, vector<1x16xf32>
    %79 = vector.broadcast %78 : vector<1x16xf32> to vector<7x16xf32>
    %80 = arith.addf %77, %79 : vector<7x16xf32>
    %cst_46 = arith.constant 0.000000e+00 : f32
    %81 = vector.broadcast %cst_46 : f32 to vector<7x16xf32>
    %82 = arith.maximumf %80, %81 : vector<7x16xf32>
    %83 = vector.extract_strided_slice %82 {offsets = [0, 0], sizes = [3, 16], strides = [1, 1]} : vector<7x16xf32> to vector<3x16xf32>
    %c0_47 = arith.constant 0 : index
    %c0_48 = arith.constant 0 : index
    %c0_49 = arith.constant 0 : index
    %84 = vector.load %arg5[%c0_47, %c0_48, %c0_49] : memref<5x16x16xf32, #tpu.memory_space<vmem>>, vector<1x16x16xf32>
    %85 = vector.shape_cast %84 : vector<1x16x16xf32> to vector<16x16xf32>
    %cst_50 = arith.constant dense<0.000000e+00> : vector<3x16xf32>
    %86 = tpu.matmul %83, %85, %cst_50 {dimension_numbers = #tpu.dot_dimension_numbers<[1], [0], [0], [1], [0, 0, 1, 1], [], []>} : vector<3x16xf32>, vector<16x16xf32>, vector<3x16xf32> -> vector<3x16xf32>
    %87 = vector.extract_strided_slice %82 {offsets = [1, 0], sizes = [3, 16], strides = [1, 1]} : vector<7x16xf32> to vector<3x16xf32>
    %c1_51 = arith.constant 1 : index
    %c0_52 = arith.constant 0 : index
    %c0_53 = arith.constant 0 : index
    %88 = vector.load %arg5[%c1_51, %c0_52, %c0_53] : memref<5x16x16xf32, #tpu.memory_space<vmem>>, vector<1x16x16xf32>
    %89 = vector.shape_cast %88 : vector<1x16x16xf32> to vector<16x16xf32>
    %cst_54 = arith.constant dense<0.000000e+00> : vector<3x16xf32>
    %90 = tpu.matmul %87, %89, %cst_54 {dimension_numbers = #tpu.dot_dimension_numbers<[1], [0], [0], [1], [0, 0, 1, 1], [], []>} : vector<3x16xf32>, vector<16x16xf32>, vector<3x16xf32> -> vector<3x16xf32>
    %91 = arith.addf %86, %90 : vector<3x16xf32>
    %92 = vector.extract_strided_slice %82 {offsets = [2, 0], sizes = [3, 16], strides = [1, 1]} : vector<7x16xf32> to vector<3x16xf32>
    %c2_55 = arith.constant 2 : index
    %c0_56 = arith.constant 0 : index
    %c0_57 = arith.constant 0 : index
    %93 = vector.load %arg5[%c2_55, %c0_56, %c0_57] : memref<5x16x16xf32, #tpu.memory_space<vmem>>, vector<1x16x16xf32>
    %94 = vector.shape_cast %93 : vector<1x16x16xf32> to vector<16x16xf32>
    %cst_58 = arith.constant dense<0.000000e+00> : vector<3x16xf32>
    %95 = tpu.matmul %92, %94, %cst_58 {dimension_numbers = #tpu.dot_dimension_numbers<[1], [0], [0], [1], [0, 0, 1, 1], [], []>} : vector<3x16xf32>, vector<16x16xf32>, vector<3x16xf32> -> vector<3x16xf32>
    %96 = arith.addf %91, %95 : vector<3x16xf32>
    %97 = vector.extract_strided_slice %82 {offsets = [3, 0], sizes = [3, 16], strides = [1, 1]} : vector<7x16xf32> to vector<3x16xf32>
    %c3_59 = arith.constant 3 : index
    %c0_60 = arith.constant 0 : index
    %c0_61 = arith.constant 0 : index
    %98 = vector.load %arg5[%c3_59, %c0_60, %c0_61] : memref<5x16x16xf32, #tpu.memory_space<vmem>>, vector<1x16x16xf32>
    %99 = vector.shape_cast %98 : vector<1x16x16xf32> to vector<16x16xf32>
    %cst_62 = arith.constant dense<0.000000e+00> : vector<3x16xf32>
    %100 = tpu.matmul %97, %99, %cst_62 {dimension_numbers = #tpu.dot_dimension_numbers<[1], [0], [0], [1], [0, 0, 1, 1], [], []>} : vector<3x16xf32>, vector<16x16xf32>, vector<3x16xf32> -> vector<3x16xf32>
    %101 = arith.addf %96, %100 : vector<3x16xf32>
    %102 = vector.extract_strided_slice %82 {offsets = [4, 0], sizes = [3, 16], strides = [1, 1]} : vector<7x16xf32> to vector<3x16xf32>
    %c4_63 = arith.constant 4 : index
    %c0_64 = arith.constant 0 : index
    %c0_65 = arith.constant 0 : index
    %103 = vector.load %arg5[%c4_63, %c0_64, %c0_65] : memref<5x16x16xf32, #tpu.memory_space<vmem>>, vector<1x16x16xf32>
    %104 = vector.shape_cast %103 : vector<1x16x16xf32> to vector<16x16xf32>
    %cst_66 = arith.constant dense<0.000000e+00> : vector<3x16xf32>
    %105 = tpu.matmul %102, %104, %cst_66 {dimension_numbers = #tpu.dot_dimension_numbers<[1], [0], [0], [1], [0, 0, 1, 1], [], []>} : vector<3x16xf32>, vector<16x16xf32>, vector<3x16xf32> -> vector<3x16xf32>
    %106 = arith.addf %101, %105 : vector<3x16xf32>
    %cst_67 = arith.constant dense<0.000000e+00> : vector<2x16xf32>
    %107 = tpu.matmul %20, %106, %cst_67 {dimension_numbers = #tpu.dot_dimension_numbers<[1], [0], [0], [1], [0, 0, 1, 1], [], []>} : vector<2x3xf32>, vector<3x16xf32>, vector<2x16xf32> -> vector<2x16xf32>
    %c0_68 = arith.constant 0 : index
    %c0_69 = arith.constant 0 : index
    %108 = vector.load %arg6[%c0_68, %c0_69] : memref<1x16xf32, #tpu.memory_space<vmem>>, vector<1x16xf32>
    %109 = vector.broadcast %108 : vector<1x16xf32> to vector<2x16xf32>
    %110 = arith.addf %107, %109 : vector<2x16xf32>
    %cst_70 = arith.constant 0.000000e+00 : f32
    %111 = vector.broadcast %cst_70 : f32 to vector<2x16xf32>
    %112 = arith.maximumf %110, %111 : vector<2x16xf32>
    %c0_71 = arith.constant 0 : index
    %c0_72 = arith.constant 0 : index
    %113 = vector.load %arg8[%c0_71, %c0_72] : memref<1x32xf32, #tpu.memory_space<vmem>>, vector<1x32xf32>
    %114 = vector.extract_strided_slice %112 {offsets = [0, 0], sizes = [1, 16], strides = [1, 1]} : vector<2x16xf32> to vector<1x16xf32>
    %c0_73 = arith.constant 0 : index
    %c0_74 = arith.constant 0 : index
    %115 = vector.load %arg7[%c0_73, %c0_74] : memref<32x32xf32, #tpu.memory_space<vmem>>, vector<16x32xf32>
    %cst_75 = arith.constant dense<0.000000e+00> : vector<1x32xf32>
    %116 = tpu.matmul %114, %115, %cst_75 {dimension_numbers = #tpu.dot_dimension_numbers<[1], [0], [0], [1], [0, 0, 1, 1], [], []>} : vector<1x16xf32>, vector<16x32xf32>, vector<1x32xf32> -> vector<1x32xf32>
    %117 = arith.addf %113, %116 : vector<1x32xf32>
    %118 = vector.extract_strided_slice %112 {offsets = [1, 0], sizes = [1, 16], strides = [1, 1]} : vector<2x16xf32> to vector<1x16xf32>
    %c16 = arith.constant 16 : index
    %c0_76 = arith.constant 0 : index
    %119 = vector.load %arg7[%c16, %c0_76] : memref<32x32xf32, #tpu.memory_space<vmem>>, vector<16x32xf32>
    %cst_77 = arith.constant dense<0.000000e+00> : vector<1x32xf32>
    %120 = tpu.matmul %118, %119, %cst_77 {dimension_numbers = #tpu.dot_dimension_numbers<[1], [0], [0], [1], [0, 0, 1, 1], [], []>} : vector<1x16xf32>, vector<16x32xf32>, vector<1x32xf32> -> vector<1x32xf32>
    %121 = arith.addf %117, %120 : vector<1x32xf32>
    %cst_78 = arith.constant 0.000000e+00 : f32
    %122 = vector.broadcast %cst_78 : f32 to vector<1x32xf32>
    %123 = arith.maximumf %121, %122 : vector<1x32xf32>
    %c0_79 = arith.constant 0 : index
    %c0_80 = arith.constant 0 : index
    %124 = vector.load %arg9[%c0_79, %c0_80] : memref<32x32xf32, #tpu.memory_space<vmem>>, vector<32x32xf32>
    %cst_81 = arith.constant dense<0.000000e+00> : vector<1x32xf32>
    %125 = tpu.matmul %123, %124, %cst_81 {dimension_numbers = #tpu.dot_dimension_numbers<[1], [0], [0], [1], [0, 0, 1, 1], [], []>} : vector<1x32xf32>, vector<32x32xf32>, vector<1x32xf32> -> vector<1x32xf32>
    %c0_82 = arith.constant 0 : index
    %c0_83 = arith.constant 0 : index
    %126 = vector.load %arg10[%c0_82, %c0_83] : memref<1x32xf32, #tpu.memory_space<vmem>>, vector<1x32xf32>
    %127 = arith.addf %125, %126 : vector<1x32xf32>
    %cst_84 = arith.constant 0.000000e+00 : f32
    %128 = vector.broadcast %cst_84 : f32 to vector<1x32xf32>
    %129 = arith.maximumf %127, %128 : vector<1x32xf32>
    %c0_85 = arith.constant 0 : index
    %c0_86 = arith.constant 0 : index
    %130 = vector.load %arg11[%c0_85, %c0_86] : memref<32x4xf32, #tpu.memory_space<vmem>>, vector<32x4xf32>
    %cst_87 = arith.constant dense<0.000000e+00> : vector<1x4xf32>
    %131 = tpu.matmul %129, %130, %cst_87 {dimension_numbers = #tpu.dot_dimension_numbers<[1], [0], [0], [1], [0, 0, 1, 1], [], []>} : vector<1x32xf32>, vector<32x4xf32>, vector<1x4xf32> -> vector<1x4xf32>
    %c0_88 = arith.constant 0 : index
    %c0_89 = arith.constant 0 : index
    %132 = vector.load %arg12[%c0_88, %c0_89] : memref<1x4xf32, #tpu.memory_space<vmem>>, vector<1x4xf32>
    %133 = arith.addf %131, %132 : vector<1x4xf32>
    %c1_90 = arith.constant 1 : index
    %c0_91 = arith.constant 0 : index
    %c0_92 = arith.constant 0 : index
    %134 = vector.load %arg0[%c1_90, %c0_91, %c0_92] : memref<2x37x4xf32, #tpu.memory_space<vmem>>, vector<1x37x4xf32>
    %135 = vector.shape_cast %134 : vector<1x37x4xf32> to vector<37x4xf32>
    %136 = vector.extract_strided_slice %135 {offsets = [0, 0], sizes = [33, 4], strides = [1, 1]} : vector<37x4xf32> to vector<33x4xf32>
    %c0_93 = arith.constant 0 : index
    %c0_94 = arith.constant 0 : index
    %c0_95 = arith.constant 0 : index
    %137 = vector.load %arg1[%c0_93, %c0_94, %c0_95] : memref<5x4x16xf32, #tpu.memory_space<vmem>>, vector<1x4x16xf32>
    %138 = vector.shape_cast %137 : vector<1x4x16xf32> to vector<4x16xf32>
    %cst_96 = arith.constant dense<0.000000e+00> : vector<33x16xf32>
    %139 = tpu.matmul %136, %138, %cst_96 {dimension_numbers = #tpu.dot_dimension_numbers<[1], [0], [0], [1], [0, 0, 1, 1], [], []>} : vector<33x4xf32>, vector<4x16xf32>, vector<33x16xf32> -> vector<33x16xf32>
    %140 = vector.extract_strided_slice %135 {offsets = [1, 0], sizes = [33, 4], strides = [1, 1]} : vector<37x4xf32> to vector<33x4xf32>
    %c1_97 = arith.constant 1 : index
    %c0_98 = arith.constant 0 : index
    %c0_99 = arith.constant 0 : index
    %141 = vector.load %arg1[%c1_97, %c0_98, %c0_99] : memref<5x4x16xf32, #tpu.memory_space<vmem>>, vector<1x4x16xf32>
    %142 = vector.shape_cast %141 : vector<1x4x16xf32> to vector<4x16xf32>
    %cst_100 = arith.constant dense<0.000000e+00> : vector<33x16xf32>
    %143 = tpu.matmul %140, %142, %cst_100 {dimension_numbers = #tpu.dot_dimension_numbers<[1], [0], [0], [1], [0, 0, 1, 1], [], []>} : vector<33x4xf32>, vector<4x16xf32>, vector<33x16xf32> -> vector<33x16xf32>
    %144 = arith.addf %139, %143 : vector<33x16xf32>
    %145 = vector.extract_strided_slice %135 {offsets = [2, 0], sizes = [33, 4], strides = [1, 1]} : vector<37x4xf32> to vector<33x4xf32>
    %c2_101 = arith.constant 2 : index
    %c0_102 = arith.constant 0 : index
    %c0_103 = arith.constant 0 : index
    %146 = vector.load %arg1[%c2_101, %c0_102, %c0_103] : memref<5x4x16xf32, #tpu.memory_space<vmem>>, vector<1x4x16xf32>
    %147 = vector.shape_cast %146 : vector<1x4x16xf32> to vector<4x16xf32>
    %cst_104 = arith.constant dense<0.000000e+00> : vector<33x16xf32>
    %148 = tpu.matmul %145, %147, %cst_104 {dimension_numbers = #tpu.dot_dimension_numbers<[1], [0], [0], [1], [0, 0, 1, 1], [], []>} : vector<33x4xf32>, vector<4x16xf32>, vector<33x16xf32> -> vector<33x16xf32>
    %149 = arith.addf %144, %148 : vector<33x16xf32>
    %150 = vector.extract_strided_slice %135 {offsets = [3, 0], sizes = [33, 4], strides = [1, 1]} : vector<37x4xf32> to vector<33x4xf32>
    %c3_105 = arith.constant 3 : index
    %c0_106 = arith.constant 0 : index
    %c0_107 = arith.constant 0 : index
    %151 = vector.load %arg1[%c3_105, %c0_106, %c0_107] : memref<5x4x16xf32, #tpu.memory_space<vmem>>, vector<1x4x16xf32>
    %152 = vector.shape_cast %151 : vector<1x4x16xf32> to vector<4x16xf32>
    %cst_108 = arith.constant dense<0.000000e+00> : vector<33x16xf32>
    %153 = tpu.matmul %150, %152, %cst_108 {dimension_numbers = #tpu.dot_dimension_numbers<[1], [0], [0], [1], [0, 0, 1, 1], [], []>} : vector<33x4xf32>, vector<4x16xf32>, vector<33x16xf32> -> vector<33x16xf32>
    %154 = arith.addf %149, %153 : vector<33x16xf32>
    %155 = vector.extract_strided_slice %135 {offsets = [4, 0], sizes = [33, 4], strides = [1, 1]} : vector<37x4xf32> to vector<33x4xf32>
    %c4_109 = arith.constant 4 : index
    %c0_110 = arith.constant 0 : index
    %c0_111 = arith.constant 0 : index
    %156 = vector.load %arg1[%c4_109, %c0_110, %c0_111] : memref<5x4x16xf32, #tpu.memory_space<vmem>>, vector<1x4x16xf32>
    %157 = vector.shape_cast %156 : vector<1x4x16xf32> to vector<4x16xf32>
    %cst_112 = arith.constant dense<0.000000e+00> : vector<33x16xf32>
    %158 = tpu.matmul %155, %157, %cst_112 {dimension_numbers = #tpu.dot_dimension_numbers<[1], [0], [0], [1], [0, 0, 1, 1], [], []>} : vector<33x4xf32>, vector<4x16xf32>, vector<33x16xf32> -> vector<33x16xf32>
    %159 = arith.addf %154, %158 : vector<33x16xf32>
    %cst_113 = arith.constant dense<0.000000e+00> : vector<17x16xf32>
    %160 = tpu.matmul %6, %159, %cst_113 {dimension_numbers = #tpu.dot_dimension_numbers<[1], [0], [0], [1], [0, 0, 1, 1], [], []>} : vector<17x33xf32>, vector<33x16xf32>, vector<17x16xf32> -> vector<17x16xf32>
    %c0_114 = arith.constant 0 : index
    %c0_115 = arith.constant 0 : index
    %161 = vector.load %arg2[%c0_114, %c0_115] : memref<1x16xf32, #tpu.memory_space<vmem>>, vector<1x16xf32>
    %162 = vector.broadcast %161 : vector<1x16xf32> to vector<17x16xf32>
    %163 = arith.addf %160, %162 : vector<17x16xf32>
    %cst_116 = arith.constant 0.000000e+00 : f32
    %164 = vector.broadcast %cst_116 : f32 to vector<17x16xf32>
    %165 = arith.maximumf %163, %164 : vector<17x16xf32>
    %166 = vector.extract_strided_slice %165 {offsets = [0, 0], sizes = [13, 16], strides = [1, 1]} : vector<17x16xf32> to vector<13x16xf32>
    %c0_117 = arith.constant 0 : index
    %c0_118 = arith.constant 0 : index
    %c0_119 = arith.constant 0 : index
    %167 = vector.load %arg3[%c0_117, %c0_118, %c0_119] : memref<5x16x16xf32, #tpu.memory_space<vmem>>, vector<1x16x16xf32>
    %168 = vector.shape_cast %167 : vector<1x16x16xf32> to vector<16x16xf32>
    %cst_120 = arith.constant dense<0.000000e+00> : vector<13x16xf32>
    %169 = tpu.matmul %166, %168, %cst_120 {dimension_numbers = #tpu.dot_dimension_numbers<[1], [0], [0], [1], [0, 0, 1, 1], [], []>} : vector<13x16xf32>, vector<16x16xf32>, vector<13x16xf32> -> vector<13x16xf32>
    %170 = vector.extract_strided_slice %165 {offsets = [1, 0], sizes = [13, 16], strides = [1, 1]} : vector<17x16xf32> to vector<13x16xf32>
    %c1_121 = arith.constant 1 : index
    %c0_122 = arith.constant 0 : index
    %c0_123 = arith.constant 0 : index
    %171 = vector.load %arg3[%c1_121, %c0_122, %c0_123] : memref<5x16x16xf32, #tpu.memory_space<vmem>>, vector<1x16x16xf32>
    %172 = vector.shape_cast %171 : vector<1x16x16xf32> to vector<16x16xf32>
    %cst_124 = arith.constant dense<0.000000e+00> : vector<13x16xf32>
    %173 = tpu.matmul %170, %172, %cst_124 {dimension_numbers = #tpu.dot_dimension_numbers<[1], [0], [0], [1], [0, 0, 1, 1], [], []>} : vector<13x16xf32>, vector<16x16xf32>, vector<13x16xf32> -> vector<13x16xf32>
    %174 = arith.addf %169, %173 : vector<13x16xf32>
    %175 = vector.extract_strided_slice %165 {offsets = [2, 0], sizes = [13, 16], strides = [1, 1]} : vector<17x16xf32> to vector<13x16xf32>
    %c2_125 = arith.constant 2 : index
    %c0_126 = arith.constant 0 : index
    %c0_127 = arith.constant 0 : index
    %176 = vector.load %arg3[%c2_125, %c0_126, %c0_127] : memref<5x16x16xf32, #tpu.memory_space<vmem>>, vector<1x16x16xf32>
    %177 = vector.shape_cast %176 : vector<1x16x16xf32> to vector<16x16xf32>
    %cst_128 = arith.constant dense<0.000000e+00> : vector<13x16xf32>
    %178 = tpu.matmul %175, %177, %cst_128 {dimension_numbers = #tpu.dot_dimension_numbers<[1], [0], [0], [1], [0, 0, 1, 1], [], []>} : vector<13x16xf32>, vector<16x16xf32>, vector<13x16xf32> -> vector<13x16xf32>
    %179 = arith.addf %174, %178 : vector<13x16xf32>
    %180 = vector.extract_strided_slice %165 {offsets = [3, 0], sizes = [13, 16], strides = [1, 1]} : vector<17x16xf32> to vector<13x16xf32>
    %c3_129 = arith.constant 3 : index
    %c0_130 = arith.constant 0 : index
    %c0_131 = arith.constant 0 : index
    %181 = vector.load %arg3[%c3_129, %c0_130, %c0_131] : memref<5x16x16xf32, #tpu.memory_space<vmem>>, vector<1x16x16xf32>
    %182 = vector.shape_cast %181 : vector<1x16x16xf32> to vector<16x16xf32>
    %cst_132 = arith.constant dense<0.000000e+00> : vector<13x16xf32>
    %183 = tpu.matmul %180, %182, %cst_132 {dimension_numbers = #tpu.dot_dimension_numbers<[1], [0], [0], [1], [0, 0, 1, 1], [], []>} : vector<13x16xf32>, vector<16x16xf32>, vector<13x16xf32> -> vector<13x16xf32>
    %184 = arith.addf %179, %183 : vector<13x16xf32>
    %185 = vector.extract_strided_slice %165 {offsets = [4, 0], sizes = [13, 16], strides = [1, 1]} : vector<17x16xf32> to vector<13x16xf32>
    %c4_133 = arith.constant 4 : index
    %c0_134 = arith.constant 0 : index
    %c0_135 = arith.constant 0 : index
    %186 = vector.load %arg3[%c4_133, %c0_134, %c0_135] : memref<5x16x16xf32, #tpu.memory_space<vmem>>, vector<1x16x16xf32>
    %187 = vector.shape_cast %186 : vector<1x16x16xf32> to vector<16x16xf32>
    %cst_136 = arith.constant dense<0.000000e+00> : vector<13x16xf32>
    %188 = tpu.matmul %185, %187, %cst_136 {dimension_numbers = #tpu.dot_dimension_numbers<[1], [0], [0], [1], [0, 0, 1, 1], [], []>} : vector<13x16xf32>, vector<16x16xf32>, vector<13x16xf32> -> vector<13x16xf32>
    %189 = arith.addf %184, %188 : vector<13x16xf32>
    %cst_137 = arith.constant dense<0.000000e+00> : vector<7x16xf32>
    %190 = tpu.matmul %13, %189, %cst_137 {dimension_numbers = #tpu.dot_dimension_numbers<[1], [0], [0], [1], [0, 0, 1, 1], [], []>} : vector<7x13xf32>, vector<13x16xf32>, vector<7x16xf32> -> vector<7x16xf32>
    %c0_138 = arith.constant 0 : index
    %c0_139 = arith.constant 0 : index
    %191 = vector.load %arg4[%c0_138, %c0_139] : memref<1x16xf32, #tpu.memory_space<vmem>>, vector<1x16xf32>
    %192 = vector.broadcast %191 : vector<1x16xf32> to vector<7x16xf32>
    %193 = arith.addf %190, %192 : vector<7x16xf32>
    %cst_140 = arith.constant 0.000000e+00 : f32
    %194 = vector.broadcast %cst_140 : f32 to vector<7x16xf32>
    %195 = arith.maximumf %193, %194 : vector<7x16xf32>
    %196 = vector.extract_strided_slice %195 {offsets = [0, 0], sizes = [3, 16], strides = [1, 1]} : vector<7x16xf32> to vector<3x16xf32>
    %c0_141 = arith.constant 0 : index
    %c0_142 = arith.constant 0 : index
    %c0_143 = arith.constant 0 : index
    %197 = vector.load %arg5[%c0_141, %c0_142, %c0_143] : memref<5x16x16xf32, #tpu.memory_space<vmem>>, vector<1x16x16xf32>
    %198 = vector.shape_cast %197 : vector<1x16x16xf32> to vector<16x16xf32>
    %cst_144 = arith.constant dense<0.000000e+00> : vector<3x16xf32>
    %199 = tpu.matmul %196, %198, %cst_144 {dimension_numbers = #tpu.dot_dimension_numbers<[1], [0], [0], [1], [0, 0, 1, 1], [], []>} : vector<3x16xf32>, vector<16x16xf32>, vector<3x16xf32> -> vector<3x16xf32>
    %200 = vector.extract_strided_slice %195 {offsets = [1, 0], sizes = [3, 16], strides = [1, 1]} : vector<7x16xf32> to vector<3x16xf32>
    %c1_145 = arith.constant 1 : index
    %c0_146 = arith.constant 0 : index
    %c0_147 = arith.constant 0 : index
    %201 = vector.load %arg5[%c1_145, %c0_146, %c0_147] : memref<5x16x16xf32, #tpu.memory_space<vmem>>, vector<1x16x16xf32>
    %202 = vector.shape_cast %201 : vector<1x16x16xf32> to vector<16x16xf32>
    %cst_148 = arith.constant dense<0.000000e+00> : vector<3x16xf32>
    %203 = tpu.matmul %200, %202, %cst_148 {dimension_numbers = #tpu.dot_dimension_numbers<[1], [0], [0], [1], [0, 0, 1, 1], [], []>} : vector<3x16xf32>, vector<16x16xf32>, vector<3x16xf32> -> vector<3x16xf32>
    %204 = arith.addf %199, %203 : vector<3x16xf32>
    %205 = vector.extract_strided_slice %195 {offsets = [2, 0], sizes = [3, 16], strides = [1, 1]} : vector<7x16xf32> to vector<3x16xf32>
    %c2_149 = arith.constant 2 : index
    %c0_150 = arith.constant 0 : index
    %c0_151 = arith.constant 0 : index
    %206 = vector.load %arg5[%c2_149, %c0_150, %c0_151] : memref<5x16x16xf32, #tpu.memory_space<vmem>>, vector<1x16x16xf32>
    %207 = vector.shape_cast %206 : vector<1x16x16xf32> to vector<16x16xf32>
    %cst_152 = arith.constant dense<0.000000e+00> : vector<3x16xf32>
    %208 = tpu.matmul %205, %207, %cst_152 {dimension_numbers = #tpu.dot_dimension_numbers<[1], [0], [0], [1], [0, 0, 1, 1], [], []>} : vector<3x16xf32>, vector<16x16xf32>, vector<3x16xf32> -> vector<3x16xf32>
    %209 = arith.addf %204, %208 : vector<3x16xf32>
    %210 = vector.extract_strided_slice %195 {offsets = [3, 0], sizes = [3, 16], strides = [1, 1]} : vector<7x16xf32> to vector<3x16xf32>
    %c3_153 = arith.constant 3 : index
    %c0_154 = arith.constant 0 : index
    %c0_155 = arith.constant 0 : index
    %211 = vector.load %arg5[%c3_153, %c0_154, %c0_155] : memref<5x16x16xf32, #tpu.memory_space<vmem>>, vector<1x16x16xf32>
    %212 = vector.shape_cast %211 : vector<1x16x16xf32> to vector<16x16xf32>
    %cst_156 = arith.constant dense<0.000000e+00> : vector<3x16xf32>
    %213 = tpu.matmul %210, %212, %cst_156 {dimension_numbers = #tpu.dot_dimension_numbers<[1], [0], [0], [1], [0, 0, 1, 1], [], []>} : vector<3x16xf32>, vector<16x16xf32>, vector<3x16xf32> -> vector<3x16xf32>
    %214 = arith.addf %209, %213 : vector<3x16xf32>
    %215 = vector.extract_strided_slice %195 {offsets = [4, 0], sizes = [3, 16], strides = [1, 1]} : vector<7x16xf32> to vector<3x16xf32>
    %c4_157 = arith.constant 4 : index
    %c0_158 = arith.constant 0 : index
    %c0_159 = arith.constant 0 : index
    %216 = vector.load %arg5[%c4_157, %c0_158, %c0_159] : memref<5x16x16xf32, #tpu.memory_space<vmem>>, vector<1x16x16xf32>
    %217 = vector.shape_cast %216 : vector<1x16x16xf32> to vector<16x16xf32>
    %cst_160 = arith.constant dense<0.000000e+00> : vector<3x16xf32>
    %218 = tpu.matmul %215, %217, %cst_160 {dimension_numbers = #tpu.dot_dimension_numbers<[1], [0], [0], [1], [0, 0, 1, 1], [], []>} : vector<3x16xf32>, vector<16x16xf32>, vector<3x16xf32> -> vector<3x16xf32>
    %219 = arith.addf %214, %218 : vector<3x16xf32>
    %cst_161 = arith.constant dense<0.000000e+00> : vector<2x16xf32>
    %220 = tpu.matmul %20, %219, %cst_161 {dimension_numbers = #tpu.dot_dimension_numbers<[1], [0], [0], [1], [0, 0, 1, 1], [], []>} : vector<2x3xf32>, vector<3x16xf32>, vector<2x16xf32> -> vector<2x16xf32>
    %c0_162 = arith.constant 0 : index
    %c0_163 = arith.constant 0 : index
    %221 = vector.load %arg6[%c0_162, %c0_163] : memref<1x16xf32, #tpu.memory_space<vmem>>, vector<1x16xf32>
    %222 = vector.broadcast %221 : vector<1x16xf32> to vector<2x16xf32>
    %223 = arith.addf %220, %222 : vector<2x16xf32>
    %cst_164 = arith.constant 0.000000e+00 : f32
    %224 = vector.broadcast %cst_164 : f32 to vector<2x16xf32>
    %225 = arith.maximumf %223, %224 : vector<2x16xf32>
    %c0_165 = arith.constant 0 : index
    %c0_166 = arith.constant 0 : index
    %226 = vector.load %arg8[%c0_165, %c0_166] : memref<1x32xf32, #tpu.memory_space<vmem>>, vector<1x32xf32>
    %227 = vector.extract_strided_slice %225 {offsets = [0, 0], sizes = [1, 16], strides = [1, 1]} : vector<2x16xf32> to vector<1x16xf32>
    %c0_167 = arith.constant 0 : index
    %c0_168 = arith.constant 0 : index
    %228 = vector.load %arg7[%c0_167, %c0_168] : memref<32x32xf32, #tpu.memory_space<vmem>>, vector<16x32xf32>
    %cst_169 = arith.constant dense<0.000000e+00> : vector<1x32xf32>
    %229 = tpu.matmul %227, %228, %cst_169 {dimension_numbers = #tpu.dot_dimension_numbers<[1], [0], [0], [1], [0, 0, 1, 1], [], []>} : vector<1x16xf32>, vector<16x32xf32>, vector<1x32xf32> -> vector<1x32xf32>
    %230 = arith.addf %226, %229 : vector<1x32xf32>
    %231 = vector.extract_strided_slice %225 {offsets = [1, 0], sizes = [1, 16], strides = [1, 1]} : vector<2x16xf32> to vector<1x16xf32>
    %c16_170 = arith.constant 16 : index
    %c0_171 = arith.constant 0 : index
    %232 = vector.load %arg7[%c16_170, %c0_171] : memref<32x32xf32, #tpu.memory_space<vmem>>, vector<16x32xf32>
    %cst_172 = arith.constant dense<0.000000e+00> : vector<1x32xf32>
    %233 = tpu.matmul %231, %232, %cst_172 {dimension_numbers = #tpu.dot_dimension_numbers<[1], [0], [0], [1], [0, 0, 1, 1], [], []>} : vector<1x16xf32>, vector<16x32xf32>, vector<1x32xf32> -> vector<1x32xf32>
    %234 = arith.addf %230, %233 : vector<1x32xf32>
    %cst_173 = arith.constant 0.000000e+00 : f32
    %235 = vector.broadcast %cst_173 : f32 to vector<1x32xf32>
    %236 = arith.maximumf %234, %235 : vector<1x32xf32>
    %c0_174 = arith.constant 0 : index
    %c0_175 = arith.constant 0 : index
    %237 = vector.load %arg9[%c0_174, %c0_175] : memref<32x32xf32, #tpu.memory_space<vmem>>, vector<32x32xf32>
    %cst_176 = arith.constant dense<0.000000e+00> : vector<1x32xf32>
    %238 = tpu.matmul %236, %237, %cst_176 {dimension_numbers = #tpu.dot_dimension_numbers<[1], [0], [0], [1], [0, 0, 1, 1], [], []>} : vector<1x32xf32>, vector<32x32xf32>, vector<1x32xf32> -> vector<1x32xf32>
    %c0_177 = arith.constant 0 : index
    %c0_178 = arith.constant 0 : index
    %239 = vector.load %arg10[%c0_177, %c0_178] : memref<1x32xf32, #tpu.memory_space<vmem>>, vector<1x32xf32>
    %240 = arith.addf %238, %239 : vector<1x32xf32>
    %cst_179 = arith.constant 0.000000e+00 : f32
    %241 = vector.broadcast %cst_179 : f32 to vector<1x32xf32>
    %242 = arith.maximumf %240, %241 : vector<1x32xf32>
    %c0_180 = arith.constant 0 : index
    %c0_181 = arith.constant 0 : index
    %243 = vector.load %arg11[%c0_180, %c0_181] : memref<32x4xf32, #tpu.memory_space<vmem>>, vector<32x4xf32>
    %cst_182 = arith.constant dense<0.000000e+00> : vector<1x4xf32>
    %244 = tpu.matmul %242, %243, %cst_182 {dimension_numbers = #tpu.dot_dimension_numbers<[1], [0], [0], [1], [0, 0, 1, 1], [], []>} : vector<1x32xf32>, vector<32x4xf32>, vector<1x4xf32> -> vector<1x4xf32>
    %c0_183 = arith.constant 0 : index
    %c0_184 = arith.constant 0 : index
    %245 = vector.load %arg12[%c0_183, %c0_184] : memref<1x4xf32, #tpu.memory_space<vmem>>, vector<1x4xf32>
    %246 = arith.addf %244, %245 : vector<1x4xf32>
    %247 = tpu.concatenate %133, %246 in 0 : vector<1x4xf32>, vector<1x4xf32> -> vector<2x4xf32>
    %c0_185 = arith.constant 0 : index
    %c0_186 = arith.constant 0 : index
    %248 = vector.load %arg13[%c0_185, %c0_186] : memref<2x4xf32, #tpu.memory_space<vmem>>, vector<2x4xf32>
    tpu.vector_store %arg13[%c0_185, %c0_186], %247 {strides = array<i32>} : memref<2x4xf32, #tpu.memory_space<vmem>>, vector<2x4xf32>,
    return
  }
}

</mosaic_0001>

<bundles_post_ra>
// kernel: dqn_forward.1
= control target key start
LH: loop header
LB: loop body
LE: loop exit
PB: predicated region body
PF: predicated region fallthrough
CT: control target
= control target key end

     0   :  { %vm97_vm0 = vcmask 1043456   ;;  %vm76_vm1 = vcmask 1046528   ;;  %vm86_vm2 = vcmask 31744   ;;  %vm180_vm3 = vcmask 1045504   ;;  %s2440_s0 = inlined_call_operand.vmem [shape: f32[2,37,4], index: 0, kind: input, shape index: {}]   ;;  %s2441_s1 = inlined_call_operand.vmem [shape: f32[5,4,16], index: 1, kind: input, shape index: {}]   ;;  %s2442_s2 = inlined_call_operand.vmem [shape: f32[1,16], index: 2, kind: input, shape index: {}]   ;;  %s2443_s3 = inlined_call_operand.vmem [shape: f32[5,16,16], index: 3, kind: input, shape index: {}]   ;;  %s2444_s4 = inlined_call_operand.vmem [shape: f32[1,16], index: 4, kind: input, shape index: {}]   ;;  %s2445_s5 = inlined_call_operand.vmem [shape: f32[5,16,16], index: 5, kind: input, shape index: {}]   ;;  %s2446_s6 = inlined_call_operand.vmem [shape: f32[1,16], index: 6, kind: input, shape index: {}]   ;;  %s2447_s7 = inlined_call_operand.vmem [shape: f32[32,32], index: 7, kind: input, shape index: {}]   ;;  %s2448_s8 = inlined_call_operand.vmem [shape: f32[1,32], index: 8, kind: input, shape index: {}]   ;;  %s2449_s9 = inlined_call_operand.vmem [shape: f32[32,32], index: 9, kind: input, shape index: {}]   ;;  %s2450_s10 = inlined_call_operand.vmem [shape: f32[1,32], index: 10, kind: input, shape index: {}]   ;;  %s2451_s11 = inlined_call_operand.vmem [shape: f32[32,4], index: 11, kind: input, shape index: {}]   ;;  %s2452_s12 = inlined_call_operand.vmem [shape: f32[1,4], index: 12, kind: input, shape index: {}]   ;;  %s2453_s13 = inlined_call_operand.hbm [shape: f32[2,4], index: 13, kind: output, shape index: {}]  }
   0x1   :  { %v1884_v0 = vld [vmem:[%s2441_s1 + $0x4] sm:$0xf]  ;;  %v1889_v1 = vld [vmem:[%s2441_s1] sm:$0xf]  ;;  %v1903_v3 = vld [vmem:[%s2441_s1 + $0x8] sm:$0xf] }
   0x2   :  { %v1894_v2 = vld [vmem:[%s2440_s0] sm:$0xff]  ;;  %1640 = vmatpush.msk.msra.mxu0 %vm97_vm0, %v1884_v0  ;;  %1646 = vmatpush.msk.msra.mxu1 %vm97_vm0, %v1889_v1  ;;  %v1908_v4 = vld [vmem:[%s2440_s0 + $0x8] sm:$0xff]  ;;  %vm242_vm4 = vcmask 1044480   ;;  %v65_v12 = vld [vmem:[%s2440_s0 + $0x10] sm:$0xff] }
   0x3   :  { %v77_v5 = vrot.slane %v1894_v2, 1  ;;  %1653 = vmatpush.msk.msra.mxu2 %vm97_vm0, %v1903_v3  ;;  %v78_v6 = vrot.slane %v1908_v4, 1  ;;  %1647 = vmatmul.msk.f32.vlgmr.msra.gmra.mxu1 %vm86_vm2, %v1894_v2  ;;  %v181_v7 = vrot.slane %v1894_v2, 2  ;;  %v182_v8 = vrot.slane %v1908_v4, 2  ;;  %v1921_v9 = vld [vmem:[%s2441_s1 + $0xc] sm:$0xf] }
   0x4   :  { %1660 = vmatpush.msk.msra.mxu3 %vm97_vm0, %v1921_v9  ;;  %v243_v10 = vrot.slane %v1894_v2, 3  ;;  %v244_v11 = vrot.slane %v1908_v4, 3  ;;  %v1935_v15 = vld [vmem:[%s2441_s1 + $0x10] sm:$0xf]  ;;  %v80_v17 = vrot.slane %v65_v12, 1  ;;  %v184_v18 = vrot.slane %v65_v12, 2 }
   0x5   :  { %v79_v13 = vsel %vm76_vm1, %v77_v5, %v78_v6  ;;  %v183_v14 = vsel %vm180_vm3, %v181_v7, %v182_v8  ;;  %1667 = vmatpush.msk.msrb.mxu0 %vm97_vm0, %v1935_v15  ;;  %v246_v19 = vrot.slane %v65_v12, 3 }
   0x6   :  { %1641 = vmatmul.msk.f32.vlgmr.msra.gmra.mxu0 %vm86_vm2, %v79_v13  ;;  %1654 = vmatmul.msk.f32.vlgmr.msra.gmra.mxu2 %vm86_vm2, %v183_v14  ;;  %v245_v16 = vsel %vm242_vm4, %v243_v10, %v244_v11 }
   0x7   :  { %1661 = vmatmul.msk.f32.vlgmr.msra.gmra.mxu3 %vm86_vm2, %v245_v16 }
   0x8   :  { %18 = vsyncpa [#allocation3], 0  ;;  %v81_v20 = vsel %vm76_vm1, %v78_v6, %v80_v17  ;;  %v185_v21 = vsel %vm180_vm3, %v182_v8, %v184_v18  ;;  %v247_v22 = vsel %vm242_vm4, %v244_v11, %v246_v19  ;;  %v66_v23 = vld [vmem:[%s2440_s0 + $0x18] sm:$0xff]  ;;  %v67_v30 = vld [vmem:[%s2440_s0 + $0x20] sm:$0x1f]  ;;  %v304_v37 = vrot.slane %v1894_v2, 4 }
   0x9   :  { %v82_v24 = vrot.slane %v66_v23, 1  ;;  %v186_v25 = vrot.slane %v66_v23, 2  ;;  %v248_v26 = vrot.slane %v66_v23, 3  ;;  %v84_v31 = vrot.slane %v67_v30, 1  ;;  %s1810_s23 = smov [#allocation2]   ;;  %s1627_s26 = sshll.u32 %s2453_s13, 4  ;;  %s1628_s26 = int_to_ptr.hbm [resolvable:$true] %s1627_s26 }
   0xa   :  { %v188_v32 = vrot.slane %v67_v30, 2  ;;  %v250_v33 = vrot.slane %v67_v30, 3  ;;  %v305_v38 = vrot.slane %v1908_v4, 4  ;;  %v307_v40 = vrot.slane %v65_v12, 4  ;;  %s1625_s1 = sshll.u32 %s1810_s23, 4  ;;  %s1626_s1 = int_to_ptr.vmem [resolvable:$true] %s1625_s1 }
   0xb   :  { %1648 = vmatmul.msk.f32.gmra.mxu1 %vm86_vm2, %v1908_v4  ;;  %v83_v27 = vsel %vm76_vm1, %v80_v17, %v82_v24  ;;  %v187_v28 = vsel %vm180_vm3, %v184_v18, %v186_v25  ;;  %v249_v29 = vsel %vm242_vm4, %v246_v19, %v248_v26  ;;  %v85_v34 = vsel %vm76_vm1, %v82_v24, %v84_v31 }
   0xc   :  { %v189_v35 = vsel %vm180_vm3, %v186_v25, %v188_v32  ;;  %v251_v36 = vsel %vm242_vm4, %v248_v26, %v250_v33  ;;  %v306_v39 = vsel %vm97_vm0, %v304_v37, %v305_v38  ;;  %v308_v41 = vsel %vm97_vm0, %v305_v38, %v307_v40 }
   0xd   :  { %v309_v42 = vrot.slane %v66_v23, 4  ;;  %v311_v44 = vrot.slane %v67_v30, 4  ;;  %v45_v10 = vlaneseq  ;;  %vm377_vm5 = vcmask 1040384  }
   0xe   :  { %1642 = vmatmul.msk.f32.gmra.mxu0 %vm86_vm2, %v81_v20  ;;  %1655 = vmatmul.msk.f32.gmra.mxu2 %vm86_vm2, %v185_v21  ;;  %v1809_v37 = vmov 0.0   ;;  %vm367_vm7 = vcmask 269312   ;;  %vm420_vm10 = vcmask 130048   ;;  %vm587_vm11 = vcmask 105472  }
   0xf   :  { %1662 = vmatmul.msk.f32.gmra.mxu3 %vm86_vm2, %v247_v22  ;;  %v310_v43 = vsel %vm97_vm0, %v307_v40, %v309_v42  ;;  %v312_v45 = vsel %vm97_vm0, %v309_v42, %v311_v44  ;;  %v46_v17 = vshrl.u32 %v45_v10, 7  ;;  %v50_v26 = vand.u32 127, %v45_v10 }
  0x10   :  { %vm753_vm12 = vcmask 1042432   ;;  %vm750_vm13 = vcmask 23552   ;;  %vm837_vm14 = vcmask 261120   ;;  %vm1618_vm15 = vcmask 25600  }
  0x11   :  { %v48_v40 = vadd.s32 16, %v46_v17 }
  0x13   :  { %1649 = vmatmul.msk.f32.gmra.mxu1 %vm86_vm2, %v65_v12  ;;  %v53_v42 = vmul.u32 2, %v48_v40  ;;  %v2099_v40 = vld [vmem:[%s2445_s5] sm:$0xff] }
  0x15   :  { %vm56_vm9 = vcmp.eq.s32.totalorder %v50_v26, %v53_v42  ;;  %v2104_v42 = vld [vmem:[%s2445_s5 + $0x28] sm:$0xff] }
  0x16   :  { %1643 = vmatmul.msk.f32.gmra.mxu0 %vm86_vm2, %v83_v27  ;;  %1656 = vmatmul.msk.f32.gmra.mxu2 %vm86_vm2, %v187_v28  ;;  %v51_v27 = vmul.u32 2, %v46_v17 }
  0x17   :  { %1663 = vmatmul.msk.f32.gmra.mxu3 %vm86_vm2, %v249_v29 }
  0x18   :  { %vm54_vm6 = vcmp.eq.s32.totalorder %v50_v26, %v51_v27 }
  0x19   :  { %v1987_v38 = vsel %vm54_vm6, 1.0, %v1809_v37 }
  0x1b   :  { %1650 = vmatmul.msk.f32.gmra.mxu1 %vm86_vm2, %v66_v23 }
  0x1e   :  { %1644 = vmatmul.msk.f32.gmra.mxu0 %vm86_vm2, %v85_v34  ;;  %1657 = vmatmul.msk.f32.gmra.mxu2 %vm86_vm2, %v189_v35 }
  0x1f   :  { %1664 = vmatmul.msk.f32.gmra.mxu3 %vm86_vm2, %v251_v36 }
  0x23   :  { %1651 = vmatmul.msk.f32.gmra.mxu1 %vm86_vm2, %v67_v30 }
  0x26   :  { %1645 = vmatmul.msk.f32.gmra.mxu0 %vm86_vm2, %v84_v31  ;;  %1658 = vmatmul.msk.f32.gmra.mxu2 %vm86_vm2, %v188_v32 }
  0x27   :  { %1665 = vmatmul.msk.f32.gmra.mxu3 %vm86_vm2, %v250_v33  ;;  %v47_v33 = vadd.s32 8, %v46_v17 }
  0x2e   :  { %1668 = vmatmul.msk.f32.vlgmr.msrb.gmra.mxu0 %vm86_vm2, %v306_v39  ;;  %v52_v39 = vmul.u32 2, %v47_v33 }
  0x30   :  { %vm55_vm8 = vcmp.eq.s32.totalorder %v50_v26, %v52_v39  ;;  %v2094_v39 = vld [vmem:[%s2445_s5 + $0x18] sm:$0xff] }
  0x36   :  { %1669 = vmatmul.msk.f32.gmra.mxu0 %vm86_vm2, %v308_v41  ;;  %v1991_v41 = vsel %vm55_vm8, 1.0, %v1809_v37 }
  0x3e   :  { %1670 = vmatmul.msk.f32.gmra.mxu0 %vm86_vm2, %v310_v43  ;;  %v1995_v43 = vsel %vm56_vm9, 1.0, %v1809_v37  ;;  %v2088_v37 = vld [vmem:[%s2445_s5 + $0x8] sm:$0xff] }
  0x3f   :  { %659 = vmatpush.msra.mxu0 %v2088_v37 }
  0x41   :  { %660 = vmatpush.msra.mxu0 %v2099_v40 }
  0x46   :  { %1671 = vmatmul.msk.f32.gmra.mxu0 %vm86_vm2, %v312_v45  ;;  %v2008_v45 = vld [vmem:[%s2443_s3] sm:$0xff] }
  0x4e   :  { %1672 = vmatmul.msk.f32.gmra.mxu0 %vm86_vm2, %v311_v44  ;;  %v2002_v44 = vld [vmem:[%s2443_s3 + $0x8] sm:$0xff] }
  0x4f   :  { %466 = vmatpush.msrb.mxu3 %v2002_v44 }
  0x51   :  { %467 = vmatpush.msrb.mxu3 %v2008_v45 }
  0x80   :  { %v163_v49 = vpop.f32.mrf.mxu1 }
  0x83   :  { %v118_v46 = vpop.f32.mrf.mxu0 }
  0x84   :  { %v164_v22 = vadd.f32 %v163_v49, %v118_v46  ;;  %v2014_v46 = vld [vmem:[%s2443_s3 + $0x18] sm:$0xff]  ;;  %v2031_v49 = vld [vmem:[%s2443_s3 + $0x40] sm:$0xff] }
  0x85   :  { %439 = vmatpush.msrb.mxu2 %v2014_v46 }
  0x88   :  { %v166_v53 = vpop.f32.mrf.mxu1 }
  0x89   :  { %v220_v50 = vpop.f32.mrf.mxu2 }
  0x8a   :  { %v282_v52 = vpop.f32.mrf.mxu3  ;;  %v235_v28 = vadd.f32 %v220_v50, %v164_v22  ;;  %v2038_v50 = vld [vmem:[%s2443_s3 + $0x38] sm:$0xff] }
  0x8b   :  { %v121_v47 = vpop.f32.mrf.mxu0  ;;  %534 = vmatpush.msra.mxu3 %v2038_v50 }
  0x8c   :  { %v167_v18 = vadd.f32 %v166_v53, %v121_v47  ;;  %v297_v34 = vadd.f32 %v282_v52, %v235_v28  ;;  %v2020_v47 = vld [vmem:[%s2443_s3 + $0x48] sm:$0xff]  ;;  %v2056_v53 = vld [vmem:[%s2442_s2] ss:$0 sm:$0xff] }
  0x8d   :  { %v2050_v52 = vld [vmem:[%s2443_s3 + $0x28] sm:$0xff] }
  0x90   :  { %v169_v58 = vpop.f32.mrf.mxu1 }
  0x91   :  { %v223_v55 = vpop.f32.mrf.mxu2 }
  0x92   :  { %v285_v56 = vpop.f32.mrf.mxu3  ;;  %v236_v23 = vadd.f32 %v223_v55, %v167_v18 }
  0x93   :  { %v124_v48 = vpop.f32.mrf.mxu0 }
  0x94   :  { %v170_v14 = vadd.f32 %v169_v58, %v124_v48  ;;  %v298_v31 = vadd.f32 %v285_v56, %v236_v23  ;;  %v2026_v48 = vld [vmem:[%s2443_s3 + $0x10] sm:$0xff] }
  0x95   :  { %440 = vmatpush.msrb.mxu2 %v2026_v48 }
  0x97   :  { %499 = vmatpush.msra.mxu2 %v2050_v52 }
  0x98   :  { %v172_v62 = vpop.f32.mrf.mxu1 }
  0x99   :  { %v226_v59 = vpop.f32.mrf.mxu2 }
  0x9a   :  { %v288_v60 = vpop.f32.mrf.mxu3  ;;  %v237_v19 = vadd.f32 %v226_v59, %v170_v14 }
  0x9b   :  { %v127_v51 = vpop.f32.mrf.mxu0 }
  0x9c   :  { %v173_v11 = vadd.f32 %v172_v62, %v127_v51  ;;  %v299_v29 = vadd.f32 %v288_v60, %v237_v19  ;;  %v2044_v51 = vld [vmem:[%s2443_s3 + $0x30] sm:$0xff] }
  0x9d   :  { %535 = vmatpush.msra.mxu3 %v2044_v51 }
  0xa0   :  { %v175_v5 = vpop.f32.mrf.mxu1 }
  0xa1   :  { %v229_v63 = vpop.f32.mrf.mxu2 }
  0xa2   :  { %v291_v4 = vpop.f32.mrf.mxu3  ;;  %v238_v16 = vadd.f32 %v229_v63, %v173_v11 }
  0xa3   :  { %v130_v54 = vpop.f32.mrf.mxu0 }
  0xa4   :  { %v176_v8 = vadd.f32 %v175_v5, %v130_v54  ;;  %v300_v24 = vadd.f32 %v291_v4, %v238_v16  ;;  %v2061_v54 = vld [vmem:[%s2443_s3 + $0x20] sm:$0xff] }
  0xa5   :  { %500 = vmatpush.msra.mxu2 %v2061_v54 }
  0xa9   :  { %v232_v6 = vpop.f32.mrf.mxu2 }
  0xaa   :  { %v239_v12 = vadd.f32 %v232_v6, %v176_v8  ;;  %v294_v13 = vpop.f32.mrf.mxu3 }
  0xab   :  { %v343_v57 = vpop.f32.mrf.mxu0 }
  0xac   :  { %v301_v20 = vadd.f32 %v294_v13, %v239_v12  ;;  %v358_v36 = vadd.f32 %v343_v57, %v297_v34 }
  0xb3   :  { %v346_v61 = vpop.f32.mrf.mxu0 }
  0xb4   :  { %v359_v35 = vadd.f32 %v346_v61, %v298_v31 }
  0xbb   :  { %v349_v2 = vpop.f32.mrf.mxu0 }
  0xbc   :  { %v360_v32 = vadd.f32 %v349_v2, %v299_v29 }
  0xc3   :  { %v352_v7 = vpop.f32.mrf.mxu0 }
  0xc4   :  { %v361_v30 = vadd.f32 %v352_v7, %v300_v24 }
  0xcb   :  { %v355_v21 = vpop.f32.mrf.mxu0 }
  0xcc   :  { %v362_v25 = vadd.f32 %v355_v21, %v301_v20 }
  0xce   :  { %1673 = vmatpush.msk.msrb.mxu1 %vm377_vm5, %v362_v25 }
  0xd0   :  { %393 = vmatpush.msrb.mxu1 %v361_v30 }
  0xd2   :  { %394 = vmatpush.msrb.mxu1 %v360_v32 }
  0xd4   :  { %395 = vmatpush.msrb.mxu1 %v359_v35 }
  0xd6   :  { %396 = vmatpush.msrb.mxu1 %v358_v36 }
  0xd7   :  { %1674 = vmatmul.msk.f32.vlgmr.msrb.gmra.mxu1 %vm367_vm7, %v1987_v38 }
  0xd8   :  { %572 = vmatpush.msra.mxu1 %v2020_v47 }
  0xda   :  { %573 = vmatpush.msra.mxu1 %v2031_v49 }
  0xdc   :  { %685 = vmatpush.msrb.mxu1 %v2104_v42 }
  0xdf   :  { %1675 = vmatmul.msk.f32.gmra.mxu1 %vm367_vm7, %v1991_v41 }
  0xe7   :  { %1676 = vmatmul.msk.f32.gmra.mxu1 %vm367_vm7, %v1995_v43 }
 0x154   :  { %v398_v55 = vpop.f32.mrf.mxu1 }
 0x155   :  { %v399_v56 = vadd.f32 %v2056_v53, %v398_v55  ;;  %v2111_v55 = vld [vmem:[%s2445_s5 + $0x38] sm:$0xff] }
 0x157   :  { %v407_v57 = vmax.f32 %v399_v56, 0.0  ;;  %v2118_v56 = vld [vmem:[%s2445_s5 + $0x10] sm:$0xff] }
 0x159   :  { %1681 = vmatmul.msk.f32.vlgmr.msrb.gmra.mxu3 %vm420_vm10, %v407_v57  ;;  %v417_v61 = vrot.slane %v407_v57, 1  ;;  %v549_v63 = vrot.slane %v407_v57, 4  ;;  %v513_v10 = vrot.slane %v407_v57, 3  ;;  %v478_v17 = vrot.slane %v407_v57, 2  ;;  %v2123_v57 = vld [vmem:[%s2445_s5 + $0x20] sm:$0xff] }
 0x15a   :  { %637 = vmatpush.msrb.mxu3 %v2094_v39  ;;  %686 = vmatpush.msrb.mxu1 %v2123_v57 }
 0x15c   :  { %v401_v58 = vpop.f32.mrf.mxu1  ;;  %638 = vmatpush.msrb.mxu3 %v2118_v56 }
 0x15d   :  { %v402_v59 = vadd.f32 %v2056_v53, %v401_v58  ;;  %v2128_v58 = vld [vmem:[%s2445_s5 + $0x30] sm:$0xff] }
 0x15f   :  { %v408_v60 = vmax.f32 %v402_v59, 0.0  ;;  %v2136_v59 = vld [vmem:[%s2445_s5 + $0x48] sm:$0xff] }
 0x161   :  { %1682 = vmatmul.msk.f32.gmra.mxu3 %vm420_vm10, %v408_v60  ;;  %v418_v62 = vrot.slane %v408_v60, 1  ;;  %v550_v2 = vrot.slane %v408_v60, 4  ;;  %v514_v7 = vrot.slane %v408_v60, 3  ;;  %v479_v16 = vrot.slane %v408_v60, 2  ;;  %v2141_v60 = vld [vmem:[%s2445_s5 + $0x40] sm:$0xff] }
 0x163   :  { %v419_v4 = vsel %vm76_vm1, %v417_v61, %v418_v62  ;;  %v551_v5 = vsel %vm97_vm0, %v549_v63, %v550_v2  ;;  %v515_v12 = vsel %vm242_vm4, %v513_v10, %v514_v7  ;;  %v480_v18 = vsel %vm180_vm3, %v478_v17, %v479_v16  ;;  %v2148_v61 = vld [vmem:[%s2444_s4] ss:$0 sm:$0xff] }
 0x164   :  { %v404_v6 = vpop.f32.mrf.mxu1  ;;  %1679 = vmatmul.msk.f32.vlgmr.msrb.gmra.mxu2 %vm420_vm10, %v419_v4  ;;  %1693 = vmatmul.msk.f32.vlgmr.msra.gmra.mxu1 %vm420_vm10, %v551_v5 }
 0x165   :  { %v405_v8 = vadd.f32 %v2056_v53, %v404_v6 }
 0x167   :  { %v409_v11 = vmax.f32 %v405_v8, 0.0 }
 0x169   :  { %v552_v13 = vrot.slane %v409_v11, 4  ;;  %1689 = vmatmul.msk.f32.vlgmr.msra.gmra.mxu3 %vm420_vm10, %v515_v12 }
 0x16a   :  { %739 = vmatpush.msra.mxu3 %v2136_v59 }
 0x16b   :  { %v553_v14 = vsel %vm97_vm0, %v550_v2, %v552_v13 }
 0x16c   :  { %1680 = vmatmul.msk.f32.gmra.mxu2 %vm420_vm10, %v418_v62  ;;  %1694 = vmatmul.msk.f32.gmra.mxu1 %vm420_vm10, %v553_v14 }
 0x16d   :  { %740 = vmatpush.msra.mxu3 %v2141_v60 }
 0x171   :  { %1690 = vmatmul.msk.f32.gmra.mxu3 %vm420_vm10, %v514_v7 }
 0x174   :  { %1685 = vmatmul.msk.f32.vlgmr.msra.gmra.mxu2 %vm420_vm10, %v480_v18 }
 0x17c   :  { %1686 = vmatmul.msk.f32.gmra.mxu2 %vm420_vm10, %v479_v16 }
 0x1dc   :  { %v469_v19 = vpop.f32.mrf.mxu3 }
 0x1e1   :  { %v575_v25 = vpop.f32.mrf.mxu1 }
 0x1e4   :  { %v472_v21 = vpop.f32.mrf.mxu3 }
 0x1e7   :  { %v442_v20 = vpop.f32.mrf.mxu2 }
 0x1e8   :  { %v470_v26 = vadd.f32 %v469_v19, %v442_v20  ;;  %v2162_v19 = vld [vmem:[%s2447_s7 + $0x8] sm:$0xff]  ;;  %v2168_v20 = vld [vmem:[%s2447_s7] sm:$0xff] }
 0x1e9   :  { %v578_v34 = vpop.f32.mrf.mxu1  ;;  %798 = vmatpush.msra.mxu1 %v2162_v19 }
 0x1eb   :  { %799 = vmatpush.msra.mxu1 %v2168_v20 }
 0x1ec   :  { %v537_v23 = vpop.f32.mrf.mxu3 }
 0x1ef   :  { %v445_v22 = vpop.f32.mrf.mxu2 }
 0x1f0   :  { %v473_v27 = vadd.f32 %v472_v21, %v445_v22  ;;  %v2173_v21 = vld [vmem:[%s2447_s7 + $0x18] sm:$0xff]  ;;  %v2180_v22 = vld [vmem:[%s2447_s7 + $0x10] sm:$0xff] }
 0x1f4   :  { %v540_v31 = vpop.f32.mrf.mxu3 }
 0x1f7   :  { %v502_v24 = vpop.f32.mrf.mxu2 }
 0x1f8   :  { %v508_v28 = vadd.f32 %v502_v24, %v470_v26 }
 0x1fa   :  { %v543_v32 = vadd.f32 %v537_v23, %v508_v28  ;;  %v2190_v23 = vld [vmem:[%s2446_s6] ss:$0 sm:$0xff] }
 0x1fb   :  { %2461 = vst [vmem:[#allocation5_spill] sm:$0xff] %v2190_v23  ;;  %v2218_v28 = vld [vmem:[%s2449_s9] sm:$0xff] }
 0x1fc   :  { %v581_v36 = vadd.f32 %v575_v25, %v543_v32 }
 0x1ff   :  { %v505_v29 = vpop.f32.mrf.mxu2 }
 0x200   :  { %v509_v30 = vadd.f32 %v505_v29, %v473_v27  ;;  %v2224_v29 = vld [vmem:[%s2440_s0 + $0x28] sm:$0xff] }
 0x202   :  { %v544_v33 = vadd.f32 %v540_v31, %v509_v30  ;;  %v2233_v30 = vld [vmem:[%s2440_s0 + $0x30] sm:$0xff]  ;;  %v901_v31 = vrot.slane %v2224_v29, 1 }
 0x203   :  { %v902_v32 = vrot.slane %v2233_v30, 1 }
 0x204   :  { %v582_v35 = vadd.f32 %v578_v34, %v544_v33 }
 0x205   :  { %v903_v33 = vsel %vm76_vm1, %v901_v31, %v902_v32 }
 0x206   :  { %1695 = vmatpush.msk.msrb.mxu2 %vm242_vm4, %v582_v35 }
 0x208   :  { %608 = vmatpush.msrb.mxu2 %v581_v36  ;;  %v2256_v36 = vld [vmem:[%s2448_s8] sm:$0x1] }
 0x209   :  { %1696 = vmatmul.msk.f32.vlgmr.msrb.gmra.mxu2 %vm587_vm11, %v1987_v38  ;;  %2462 = vst [vmem:[#allocation6_spill] sm:$0xff] %v2256_v36 }
 0x20a   :  { %712 = vmatpush.msra.mxu2 %v2111_v55 }
 0x20c   :  { %713 = vmatpush.msra.mxu2 %v2128_v58 }
 0x20e   :  { %824 = vmatpush.msrb.mxu2 %v2173_v21 }
 0x210   :  { %825 = vmatpush.msrb.mxu2 %v2180_v22 }
 0x28c   :  { %v610_v62 = vpop.f32.mrf.mxu2 }
 0x28d   :  { %v611_v63 = vadd.f32 %v2148_v61, %v610_v62 }
 0x28f   :  { %v613_v2 = vmax.f32 %v611_v63, 0.0 }
 0x291   :  { %1700 = vmatmul.msk.f32.vlgmr.msra.gmra.mxu0 %vm420_vm10, %v613_v2  ;;  %v620_v4 = vrot.slane %v613_v2, 1  ;;  %v668_v5 = vrot.slane %v613_v2, 2  ;;  %v695_v6 = vrot.slane %v613_v2, 3  ;;  %v722_v7 = vrot.slane %v613_v2, 4 }
 0x293   :  { %1699 = vmatmul.msk.f32.vlgmr.msrb.gmra.mxu3 %vm420_vm10, %v620_v4  ;;  %1703 = vmatmul.msk.f32.vlgmr.msrb.gmra.mxu1 %vm420_vm10, %v668_v5 }
 0x294   :  { %1706 = vmatmul.msk.f32.vlgmr.msra.gmra.mxu2 %vm420_vm10, %v695_v6  ;;  %1721 = vmatpush.msk.msrb.mxu1 %vm97_vm0, %v1884_v0  ;;  %v2200_v0 = vld [vmem:[%s2449_s9 + $0x18] sm:$0xff] }
 0x295   :  { %1727 = vmatpush.msk.msra.mxu2 %vm97_vm0, %v1889_v1  ;;  %853 = vmatpush.msrb.mxu3 %v2200_v0  ;;  %v2206_v1 = vld [vmem:[%s2449_s9 + $0x10] sm:$0xff] }
 0x297   :  { %854 = vmatpush.msrb.mxu3 %v2206_v1 }
 0x29b   :  { %1709 = vmatmul.msk.f32.vlgmr.msra.gmra.mxu3 %vm420_vm10, %v722_v7  ;;  %v2272_v7 = vld [vmem:[%s2440_s0 + $0x48] sm:$0x1f] }
 0x30e   :  { %v662_v8 = vpop.f32.mrf.mxu0 }
 0x310   :  { %v688_v12 = vpop.f32.mrf.mxu1 }
 0x316   :  { %v640_v10 = vpop.f32.mrf.mxu3 }
 0x317   :  { %v663_v11 = vadd.f32 %v662_v8, %v640_v10  ;;  %v715_v14 = vpop.f32.mrf.mxu2  ;;  %v2278_v8 = vld [vmem:[%s2451_s11 + $0x18] sm:$0xff]  ;;  %v908_v10 = vrot.slane %v2272_v7, 1 }
 0x318   :  { %2463 = vst [vmem:[#allocation7_spill] sm:$0xff] %v2278_v8 }
 0x319   :  { %v691_v13 = vadd.f32 %v688_v12, %v663_v11  ;;  %v994_v11 = vrot.slane %v2224_v29, 2  ;;  %v995_v12 = vrot.slane %v2233_v30, 2 }
 0x31b   :  { %v718_v16 = vadd.f32 %v715_v14, %v691_v13  ;;  %v996_v14 = vsel %vm180_vm3, %v994_v11, %v995_v12 }
 0x31e   :  { %v742_v17 = vpop.f32.mrf.mxu3 }
 0x31f   :  { %v745_v18 = vadd.f32 %v742_v17, %v718_v16 }
 0x321   :  { %1710 = vmatpush.msk.msrb.mxu0 %vm753_vm12, %v745_v18  ;;  %v1001_v18 = vrot.slane %v2272_v7, 2 }
 0x322   :  { %1711 = vmatmul.msk.f32.vlgmr.msrb.gmra.mxu0 %vm750_vm13, %v1987_v38 }
 0x323   :  { %882 = vmatpush.msra.mxu0 %v2278_v8 }
 0x39f   :  { %v774_v24 = vpop.f32.mrf.mxu0 }
 0x3a0   :  { %v775_v25 = vadd.f32 %v2190_v23, %v774_v24 }
 0x3a2   :  { %v777_v26 = vmax.f32 %v775_v25, 0.0  ;;  %v2320_v25 = vld [vmem:[%s2451_s11] sm:$0xff] }
 0x3a3   :  { %2466 = vst [vmem:[#allocation10_spill] sm:$0xff] %v2320_v25 }
 0x3a4   :  { %v807_v27 = vrot.slane %v777_v26, 1  ;;  %1712 = vmatmul.msk.f32.vlgmr.msra.gmra.mxu1 %vm420_vm10, %v777_v26  ;;  %v1106_v26 = vrot.slane %v2224_v29, 4 }
 0x3a5   :  { %1745 = vmatpush.msk.msra.mxu1 %vm97_vm0, %v1935_v15  ;;  %v2212_v15 = vld [vmem:[%s2449_s9 + $0x8] sm:$0xff] }
 0x3a6   :  { %1713 = vmatmul.msk.f32.vlgmr.msrb.gmra.mxu2 %vm420_vm10, %v807_v27  ;;  %855 = vmatpush.msrb.mxu3 %v2212_v15  ;;  %v1107_v27 = vrot.slane %v2233_v30, 4 }
 0x3a8   :  { %856 = vmatpush.msrb.mxu3 %v2218_v28  ;;  %v1108_v31 = vsel %vm97_vm0, %v1106_v26, %v1107_v27 }
 0x3aa   :  { %1733 = vmatpush.msk.msra.mxu3 %vm97_vm0, %v1903_v3  ;;  %v2246_v3 = vld [vmem:[%s2440_s0 + $0x38] sm:$0xff] }
 0x3ab   :  { %v904_v34 = vrot.slane %v2246_v3, 1  ;;  %v997_v16 = vrot.slane %v2246_v3, 2  ;;  %v1053_v11 = vrot.slane %v2246_v3, 3 }
 0x3ac   :  { %1722 = vmatmul.msk.f32.vlgmr.msrb.gmra.mxu1 %vm86_vm2, %v903_v33 }
 0x3ad   :  { %1416 = vmatpush.msrb.mxu1 %v2088_v37  ;;  %v905_v35 = vsel %vm76_vm1, %v902_v32, %v904_v34  ;;  %v998_v17 = vsel %vm180_vm3, %v995_v12, %v997_v16  ;;  %v1109_v32 = vrot.slane %v2246_v3, 4 }
 0x3ae   :  { %1728 = vmatmul.msk.f32.vlgmr.msra.gmra.mxu2 %vm86_vm2, %v2224_v29 }
 0x3af   :  { %1417 = vmatpush.msrb.mxu1 %v2099_v40  ;;  %v2261_v40 = vld [vmem:[%s2440_s0 + $0x40] sm:$0xff]  ;;  %v1110_v33 = vsel %vm97_vm0, %v1107_v27, %v1109_v32 }
 0x3b0   :  { %v906_v62 = vrot.slane %v2261_v40, 1 }
 0x3b2   :  { %v907_v2 = vsel %vm76_vm1, %v904_v34, %v906_v62  ;;  %v909_v13 = vsel %vm76_vm1, %v906_v62, %v908_v10  ;;  %v1111_v34 = vrot.slane %v2261_v40, 4 }
 0x3b4   :  { %1723 = vmatmul.msk.f32.gmra.mxu1 %vm86_vm2, %v905_v35  ;;  %v1112_v35 = vsel %vm97_vm0, %v1109_v32, %v1111_v34 }
 0x3b6   :  { %1729 = vmatmul.msk.f32.gmra.mxu2 %vm86_vm2, %v2233_v30 }
 0x3bc   :  { %1724 = vmatmul.msk.f32.gmra.mxu1 %vm86_vm2, %v907_v2  ;;  %v1113_v2 = vrot.slane %v2272_v7, 4 }
 0x3be   :  { %1730 = vmatmul.msk.f32.gmra.mxu2 %vm86_vm2, %v2246_v3 }
 0x3c4   :  { %1725 = vmatmul.msk.f32.gmra.mxu1 %vm86_vm2, %v909_v13 }
 0x3c6   :  { %1731 = vmatmul.msk.f32.gmra.mxu2 %vm86_vm2, %v2261_v40 }
 0x3cc   :  { %1726 = vmatmul.msk.f32.gmra.mxu1 %vm86_vm2, %v908_v10 }
 0x3ce   :  { %1732 = vmatmul.msk.f32.gmra.mxu2 %vm86_vm2, %v2272_v7 }
 0x3d4   :  { %1746 = vmatmul.msk.f32.vlgmr.msra.gmra.mxu1 %vm86_vm2, %v1108_v31 }
 0x3dc   :  { %1747 = vmatmul.msk.f32.gmra.mxu1 %vm86_vm2, %v1110_v33 }
 0x3e4   :  { %1748 = vmatmul.msk.f32.gmra.mxu1 %vm86_vm2, %v1112_v35 }
 0x421   :  { %v801_v37 = vpop.f32.mrf.mxu1 }
 0x422   :  { %v804_v63 = vadd.f32 %v801_v37, %v2256_v36 }
 0x429   :  { %v827_v4 = vpop.f32.mrf.mxu2 }
 0x42a   :  { %v830_v5 = vadd.f32 %v827_v4, %v804_v63  ;;  %v1050_v4 = vrot.slane %v2224_v29, 3  ;;  %v1055_v29 = vrot.slane %v2261_v40, 3 }
 0x42c   :  { %v831_v6 = vmax.f32 %v830_v5, 0.0  ;;  %v1051_v5 = vrot.slane %v2233_v30, 3  ;;  %v1057_v30 = vrot.slane %v2272_v7, 3 }
 0x42e   :  { %1714 = vmatmul.msk.f32.vlgmr.msrb.gmra.mxu3 %vm837_vm14, %v831_v6  ;;  %v1114_v6 = vsel %vm97_vm0, %v1111_v34, %v1113_v2  ;;  %v1052_v10 = vsel %vm242_vm4, %v1050_v4, %v1051_v5  ;;  %v1058_v3 = vsel %vm242_vm4, %v1055_v29, %v1057_v30 }
 0x42f   :  { %1217 = vmatpush.msrb.mxu3 %v2014_v46  ;;  %v999_v46 = vrot.slane %v2261_v40, 2  ;;  %1749 = vmatmul.msk.f32.gmra.mxu1 %vm86_vm2, %v1114_v6 }
 0x431   :  { %1218 = vmatpush.msrb.mxu3 %v2026_v48  ;;  %v1000_v48 = vsel %vm180_vm3, %v997_v16, %v999_v46  ;;  %v1002_v24 = vsel %vm180_vm3, %v999_v46, %v1001_v18  ;;  %v979_v16 = vpop.f32.mrf.mxu2 }
 0x436   :  { %1734 = vmatmul.msk.f32.vlgmr.msra.gmra.mxu3 %vm86_vm2, %v996_v14 }
 0x437   :  { %1274 = vmatpush.msra.mxu3 %v2050_v52  ;;  %v2308_v52 = vld [vmem:[%s2451_s11 + $0x10] sm:$0xff]  ;;  %1750 = vmatmul.msk.f32.gmra.mxu1 %vm86_vm2, %v1113_v2 }
 0x438   :  { %2464 = vst [vmem:[#allocation8_spill] sm:$0xff] %v2308_v52  ;;  %883 = vmatpush.msra.mxu0 %v2308_v52 }
 0x439   :  { %1275 = vmatpush.msra.mxu3 %v2061_v54  ;;  %v2314_v54 = vld [vmem:[%s2451_s11 + $0x8] sm:$0xff] }
 0x43a   :  { %2465 = vst [vmem:[#allocation9_spill] sm:$0xff] %v2314_v54  ;;  %884 = vmatpush.msra.mxu0 %v2314_v54 }
 0x43c   :  { %885 = vmatpush.msra.mxu0 %v2320_v25 }
 0x43e   :  { %1735 = vmatmul.msk.f32.gmra.mxu3 %vm86_vm2, %v998_v17  ;;  %1739 = vmatpush.msk.msrb.mxu0 %vm97_vm0, %v1921_v9  ;;  %v2336_v9 = vld [vmem:[%s2450_s10] sm:$0x1] }
 0x43f   :  { %2467 = vst [vmem:[#allocation11_spill] sm:$0xff] %v2336_v9 }
 0x446   :  { %1736 = vmatmul.msk.f32.gmra.mxu3 %vm86_vm2, %v1000_v48  ;;  %v982_v48 = vpop.f32.mrf.mxu2 }
 0x44e   :  { %1737 = vmatmul.msk.f32.gmra.mxu3 %vm86_vm2, %v1002_v24  ;;  %v985_v26 = vpop.f32.mrf.mxu2 }
 0x456   :  { %1738 = vmatmul.msk.f32.gmra.mxu3 %vm86_vm2, %v1001_v18  ;;  %v988_v33 = vpop.f32.mrf.mxu2 }
 0x4b1   :  { %v858_v37 = vpop.f32.mrf.mxu3 }
 0x4b2   :  { %v859_v62 = vadd.f32 %v858_v37, %v2336_v9 }
 0x4b4   :  { %v861_v63 = vmax.f32 %v859_v62, 0.0  ;;  %v991_v62 = vpop.f32.mrf.mxu2 }
 0x4b6   :  { %1715 = vmatmul.msk.f32.vlgmr.msra.gmra.mxu0 %vm837_vm14, %v861_v63 }
 0x4b7   :  { %1244 = vmatpush.msra.mxu0 %v2002_v44  ;;  %v1054_v44 = vsel %vm242_vm4, %v1051_v5, %v1053_v11 }
 0x4b9   :  { %1245 = vmatpush.msra.mxu0 %v2008_v45  ;;  %v1056_v45 = vsel %vm242_vm4, %v1053_v11, %v1055_v29  ;;  %v1030_v17 = vpop.f32.mrf.mxu3 }
 0x4be   :  { %1740 = vmatmul.msk.f32.vlgmr.msrb.gmra.mxu0 %vm86_vm2, %v1052_v10 }
 0x4bf   :  { %1306 = vmatpush.msrb.mxu0 %v2038_v50  ;;  %v937_v50 = vpop.f32.mrf.mxu1 }
 0x4c1   :  { %1307 = vmatpush.msrb.mxu0 %v2044_v51  ;;  %v1033_v18 = vpop.f32.mrf.mxu3 }
 0x4c6   :  { %1741 = vmatmul.msk.f32.gmra.mxu0 %vm86_vm2, %v1054_v44 }
 0x4c7   :  { %v940_v51 = vpop.f32.mrf.mxu1 }
 0x4c8   :  { %v983_v10 = vadd.f32 %v982_v48, %v940_v51 }
 0x4c9   :  { %v1036_v27 = vpop.f32.mrf.mxu3 }
 0x4ca   :  { %v1046_v36 = vadd.f32 %v1033_v18, %v983_v10 }
 0x4ce   :  { %1742 = vmatmul.msk.f32.gmra.mxu0 %vm86_vm2, %v1056_v45 }
 0x4cf   :  { %v943_v12 = vpop.f32.mrf.mxu1 }
 0x4d0   :  { %v986_v6 = vadd.f32 %v985_v26, %v943_v12 }
 0x4d1   :  { %v1039_v35 = vpop.f32.mrf.mxu3 }
 0x4d6   :  { %1743 = vmatmul.msk.f32.gmra.mxu0 %vm86_vm2, %v1058_v3  ;;  %v1047_v3 = vadd.f32 %v1036_v27, %v986_v6 }
 0x4d7   :  { %v946_v13 = vpop.f32.mrf.mxu1 }
 0x4d8   :  { %v989_v2 = vadd.f32 %v988_v33, %v946_v13 }
 0x4d9   :  { %v1042_v5 = vpop.f32.mrf.mxu3 }
 0x4da   :  { %v1048_v11 = vadd.f32 %v1039_v35, %v989_v2 }
 0x4de   :  { %1744 = vmatmul.msk.f32.gmra.mxu0 %vm86_vm2, %v1057_v30  ;;  %v980_v30 = vadd.f32 %v979_v16, %v937_v50 }
 0x4df   :  { %v949_v14 = vpop.f32.mrf.mxu1 }
 0x4e0   :  { %v992_v4 = vadd.f32 %v991_v62, %v949_v14  ;;  %v1045_v54 = vadd.f32 %v1030_v17, %v980_v30 }
 0x4e2   :  { %v1049_v44 = vadd.f32 %v1042_v5, %v992_v4 }
 0x4e7   :  { %v1142_v46 = vpop.f32.mrf.mxu1 }
 0x4ef   :  { %v1145_v7 = vpop.f32.mrf.mxu1 }
 0x4f7   :  { %v1148_v32 = vpop.f32.mrf.mxu1 }
 0x4ff   :  { %v1151_v37 = vpop.f32.mrf.mxu1 }
 0x507   :  { %v1154_v45 = vpop.f32.mrf.mxu1 }
 0x533   :  { %v2364_v40 = vpop.f32.mrf.mxu0 }
 0x534   :  { %2468 = vst [vmem:[#allocation12_spill] sm:$0xff] %v2364_v40 }
 0x53b   :  { %v1086_v24 = vpop.f32.mrf.mxu0 }
 0x53c   :  { %v1101_v13 = vadd.f32 %v1086_v24, %v1045_v54 }
 0x53e   :  { %v1157_v12 = vadd.f32 %v1142_v46, %v1101_v13 }
 0x543   :  { %v1089_v31 = vpop.f32.mrf.mxu0 }
 0x544   :  { %v1102_v52 = vadd.f32 %v1089_v31, %v1046_v36 }
 0x546   :  { %v1158_v51 = vadd.f32 %v1145_v7, %v1102_v52 }
 0x54b   :  { %v1092_v34 = vpop.f32.mrf.mxu0 }
 0x54c   :  { %v1103_v23 = vadd.f32 %v1092_v34, %v1047_v3 }
 0x54e   :  { %v1159_v14 = vadd.f32 %v1148_v32, %v1103_v23 }
 0x553   :  { %v1095_v63 = vpop.f32.mrf.mxu0 }
 0x554   :  { %v1104_v40 = vadd.f32 %v1095_v63, %v1048_v11 }
 0x556   :  { %v1160_v8 = vadd.f32 %v1151_v37, %v1104_v40 }
 0x55b   :  { %v1098_v29 = vpop.f32.mrf.mxu0 }
 0x55c   :  { %v1105_v9 = vadd.f32 %v1098_v29, %v1049_v44 }
 0x55e   :  { %v1161_v25 = vadd.f32 %v1154_v45, %v1105_v9 }
 0x560   :  { %1751 = vmatpush.msk.msrb.mxu2 %vm377_vm5, %v1161_v25 }
 0x562   :  { %1177 = vmatpush.msrb.mxu2 %v1160_v8 }
 0x564   :  { %1178 = vmatpush.msrb.mxu2 %v1159_v14 }
 0x566   :  { %1179 = vmatpush.msrb.mxu2 %v1158_v51 }
 0x568   :  { %1180 = vmatpush.msrb.mxu2 %v1157_v12  ;;  %v2473_v12 = vld [vmem:[#allocation5_spill] sm:$0xff] }
 0x569   :  { %1752 = vmatmul.msk.f32.vlgmr.msrb.gmra.mxu2 %vm367_vm7, %v1987_v38 }
 0x56a   :  { %1341 = vmatpush.msra.mxu2 %v2020_v47 }
 0x56c   :  { %1342 = vmatpush.msra.mxu2 %v2031_v49 }
 0x56e   :  { %1439 = vmatpush.msrb.mxu2 %v2104_v42 }
 0x570   :  { %1440 = vmatpush.msrb.mxu2 %v2123_v57 }
 0x571   :  { %1753 = vmatmul.msk.f32.gmra.mxu2 %vm367_vm7, %v1991_v41 }
 0x579   :  { %1754 = vmatmul.msk.f32.gmra.mxu2 %vm367_vm7, %v1995_v43 }
 0x5ec   :  { %v1182_v23 = vpop.f32.mrf.mxu2 }
 0x5ed   :  { %v1183_v36 = vadd.f32 %v2056_v53, %v1182_v23 }
 0x5ef   :  { %v1191_v8 = vmax.f32 %v1183_v36, 0.0 }
 0x5f1   :  { %1757 = vmatmul.msk.f32.vlgmr.msra.gmra.mxu0 %vm420_vm10, %v1191_v8  ;;  %v1196_v57 = vrot.slane %v1191_v8, 1  ;;  %v1318_v41 = vrot.slane %v1191_v8, 4  ;;  %v1285_v50 = vrot.slane %v1191_v8, 3 }
 0x5f2   :  { %1394 = vmatpush.msra.mxu0 %v2094_v39 }
 0x5f4   :  { %v1185_v47 = vpop.f32.mrf.mxu2  ;;  %1395 = vmatpush.msra.mxu0 %v2118_v56 }
 0x5f5   :  { %v1186_v49 = vadd.f32 %v2056_v53, %v1185_v47 }
 0x5f7   :  { %v1192_v42 = vmax.f32 %v1186_v49, 0.0  ;;  %v2474_v49 = vld [vmem:[#allocation6_spill] sm:$0xff] }
 0x5f9   :  { %v1197_v52 = vrot.slane %v1192_v42, 1  ;;  %1758 = vmatmul.msk.f32.gmra.mxu0 %vm420_vm10, %v1192_v42  ;;  %v1319_v43 = vrot.slane %v1192_v42, 4  ;;  %v1286_v9 = vrot.slane %v1192_v42, 3 }
 0x5fb   :  { %v1198_v54 = vsel %vm76_vm1, %v1196_v57, %v1197_v52  ;;  %v1320_v25 = vsel %vm97_vm0, %v1318_v41, %v1319_v43  ;;  %v1287_v17 = vsel %vm242_vm4, %v1285_v50, %v1286_v9  ;;  %v2476_v50 = vld [vmem:[#allocation12_spill] sm:$0xff] }
 0x5fc   :  { %1755 = vmatmul.msk.f32.vlgmr.msrb.gmra.mxu3 %vm420_vm10, %v1198_v54  ;;  %v1188_v39 = vpop.f32.mrf.mxu2  ;;  %1763 = vmatmul.msk.f32.vlgmr.msra.gmra.mxu2 %vm420_vm10, %v1320_v25 }
 0x5fd   :  { %v1189_v56 = vadd.f32 %v2056_v53, %v1188_v39  ;;  %1535 = vmatpush.msra.mxu2 %v2162_v19  ;;  %v1254_v53 = vrot.slane %v1192_v42, 2  ;;  %v1253_v19 = vrot.slane %v1191_v8, 2 }
 0x5ff   :  { %v1193_v16 = vmax.f32 %v1189_v56, 0.0  ;;  %1536 = vmatpush.msra.mxu2 %v2168_v20  ;;  %v1255_v20 = vsel %vm180_vm3, %v1253_v19, %v1254_v53 }
 0x601   :  { %1761 = vmatmul.msk.f32.vlgmr.msrb.gmra.mxu0 %vm420_vm10, %v1287_v17  ;;  %v1321_v40 = vrot.slane %v1193_v16, 4 }
 0x602   :  { %1487 = vmatpush.msrb.mxu0 %v2136_v59 }
 0x603   :  { %v1322_v46 = vsel %vm97_vm0, %v1319_v43, %v1321_v40  ;;  %v2475_v43 = vld [vmem:[#allocation11_spill] sm:$0xff] }
 0x604   :  { %1756 = vmatmul.msk.f32.gmra.mxu3 %vm420_vm10, %v1197_v52  ;;  %1764 = vmatmul.msk.f32.gmra.mxu2 %vm420_vm10, %v1322_v46 }
 0x605   :  { %1488 = vmatpush.msrb.mxu0 %v2141_v60 }
 0x609   :  { %1762 = vmatmul.msk.f32.gmra.mxu0 %vm420_vm10, %v1286_v9  ;;  %v866_v9 = vld [vmem:[%s2452_s12] sm:$0x1] }
 0x60a   :  { %v888_v16 = vadd.f32 %v2476_v50, %v866_v9 }
 0x60c   :  { %1759 = vmatmul.msk.f32.vlgmr.msra.gmra.mxu3 %vm420_vm10, %v1255_v20 }
 0x614   :  { %1760 = vmatmul.msk.f32.gmra.mxu3 %vm420_vm10, %v1254_v53 }
 0x66e   :  { %v1247_v48 = vpop.f32.mrf.mxu0 }
 0x676   :  { %v1250_v18 = vpop.f32.mrf.mxu0 }
 0x67e   :  { %v1309_v7 = vpop.f32.mrf.mxu0 }
 0x67f   :  { %v1220_v59 = vpop.f32.mrf.mxu3  ;;  %v1344_v27 = vpop.f32.mrf.mxu2 }
 0x680   :  { %v1248_v31 = vadd.f32 %v1247_v48, %v1220_v59 }
 0x686   :  { %v1312_v35 = vpop.f32.mrf.mxu0 }
 0x687   :  { %v1223_v24 = vpop.f32.mrf.mxu3  ;;  %v1347_v63 = vpop.f32.mrf.mxu2 }
 0x688   :  { %v1251_v32 = vadd.f32 %v1250_v18, %v1223_v24 }
 0x68f   :  { %v1277_v26 = vpop.f32.mrf.mxu3 }
 0x690   :  { %v1283_v60 = vadd.f32 %v1277_v26, %v1248_v31 }
 0x692   :  { %v1315_v37 = vadd.f32 %v1309_v7, %v1283_v60 }
 0x694   :  { %v1350_v4 = vadd.f32 %v1344_v27, %v1315_v37 }
 0x697   :  { %v1280_v33 = vpop.f32.mrf.mxu3 }
 0x698   :  { %v1284_v34 = vadd.f32 %v1280_v33, %v1251_v32 }
 0x69a   :  { %v1316_v62 = vadd.f32 %v1312_v35, %v1284_v34 }
 0x69c   :  { %v1351_v2 = vadd.f32 %v1347_v63, %v1316_v62 }
 0x69e   :  { %1765 = vmatpush.msk.msrb.mxu3 %vm242_vm4, %v1351_v2 }
 0x6a0   :  { %1370 = vmatpush.msrb.mxu3 %v1350_v4 }
 0x6a1   :  { %1766 = vmatmul.msk.f32.vlgmr.msrb.gmra.mxu3 %vm587_vm11, %v1987_v38 }
 0x6a2   :  { %1463 = vmatpush.msra.mxu3 %v2111_v55 }
 0x6a4   :  { %1464 = vmatpush.msra.mxu3 %v2128_v58 }
 0x6a6   :  { %1559 = vmatpush.msrb.mxu3 %v2173_v21 }
 0x6a8   :  { %1560 = vmatpush.msrb.mxu3 %v2180_v22 }
 0x724   :  { %v1372_v5 = vpop.f32.mrf.mxu3 }
 0x725   :  { %v1373_v6 = vadd.f32 %v2148_v61, %v1372_v5 }
 0x727   :  { %v1375_v10 = vmax.f32 %v1373_v6, 0.0 }
 0x729   :  { %v1422_v11 = vrot.slane %v1375_v10, 2  ;;  %v1377_v44 = vrot.slane %v1375_v10, 1  ;;  %v1446_v29 = vrot.slane %v1375_v10, 3  ;;  %1768 = vmatmul.msk.f32.vlgmr.msrb.gmra.mxu1 %vm420_vm10, %v1375_v10  ;;  %v1470_v55 = vrot.slane %v1375_v10, 4 }
 0x72b   :  { %1769 = vmatmul.msk.f32.vlgmr.msrb.gmra.mxu2 %vm420_vm10, %v1422_v11  ;;  %1767 = vmatmul.msk.f32.vlgmr.msra.gmra.mxu0 %vm420_vm10, %v1377_v44 }
 0x72c   :  { %1770 = vmatmul.msk.f32.vlgmr.msra.gmra.mxu3 %vm420_vm10, %v1446_v29  ;;  %1582 = vmatpush.msra.mxu0 %v2200_v0  ;;  %v2469_v0 = vld [vmem:[#allocation7_spill] sm:$0xff] }
 0x72e   :  { %1583 = vmatpush.msra.mxu0 %v2206_v1  ;;  %v2470_v1 = vld [vmem:[#allocation8_spill] sm:$0xff] }
 0x730   :  { %1584 = vmatpush.msra.mxu0 %v2212_v15  ;;  %v2471_v15 = vld [vmem:[#allocation9_spill] sm:$0xff] }
 0x732   :  { %1585 = vmatpush.msra.mxu0 %v2218_v28  ;;  %v2472_v28 = vld [vmem:[#allocation10_spill] sm:$0xff] }
 0x733   :  { %1771 = vmatmul.msk.f32.vlgmr.msrb.gmra.mxu0 %vm420_vm10, %v1470_v55 }
 0x7a6   :  { %v1419_v61 = vpop.f32.mrf.mxu1 }
 0x7a8   :  { %v1397_v58 = vpop.f32.mrf.mxu0 }
 0x7a9   :  { %v1420_v21 = vadd.f32 %v1419_v61, %v1397_v58 }
 0x7ae   :  { %v1442_v22 = vpop.f32.mrf.mxu2 }
 0x7af   :  { %v1445_v45 = vadd.f32 %v1442_v22, %v1420_v21  ;;  %v1466_v30 = vpop.f32.mrf.mxu3 }
 0x7b0   :  { %v1490_v13 = vpop.f32.mrf.mxu0 }
 0x7b1   :  { %v1469_v3 = vadd.f32 %v1466_v30, %v1445_v45 }
 0x7b3   :  { %v1493_v14 = vadd.f32 %v1490_v13, %v1469_v3 }
 0x7b5   :  { %1772 = vmatpush.msk.msra.mxu1 %vm753_vm12, %v1493_v14 }
 0x7b6   :  { %1773 = vmatmul.msk.f32.vlgmr.msra.gmra.mxu1 %vm750_vm13, %v1987_v38 }
 0x7b7   :  { %1606 = vmatpush.msrb.mxu1 %v2469_v0 }
 0x7b9   :  { %1607 = vmatpush.msrb.mxu1 %v2470_v1 }
 0x7bb   :  { %1608 = vmatpush.msrb.mxu1 %v2471_v15 }
 0x7bd   :  { %1609 = vmatpush.msrb.mxu1 %v2472_v28 }
 0x833   :  { %v1514_v51 = vpop.f32.mrf.mxu1 }
 0x834   :  { %v1515_v23 = vadd.f32 %v2473_v12, %v1514_v51 }
 0x836   :  { %v1517_v36 = vmax.f32 %v1515_v23, 0.0 }
 0x838   :  { %v1542_v8 = vrot.slane %v1517_v36, 1  ;;  %1774 = vmatmul.msk.f32.vlgmr.msra.gmra.mxu2 %vm420_vm10, %v1517_v36 }
 0x83a   :  { %1775 = vmatmul.msk.f32.vlgmr.msrb.gmra.mxu3 %vm420_vm10, %v1542_v8 }
 0x8bb   :  { %v1538_v47 = vpop.f32.mrf.mxu2 }
 0x8bc   :  { %v1541_v38 = vadd.f32 %v1538_v47, %v2474_v49 }
 0x8bd   :  { %v1562_v42 = vpop.f32.mrf.mxu3 }
 0x8be   :  { %v1565_v57 = vadd.f32 %v1562_v42, %v1541_v38 }
 0x8c0   :  { %v1566_v52 = vmax.f32 %v1565_v57, 0.0 }
 0x8c2   :  { %1776 = vmatmul.msk.f32.vlgmr.msra.gmra.mxu0 %vm837_vm14, %v1566_v52 }
 0x93f   :  { %v1587_v41 = vpop.f32.mrf.mxu0 }
 0x940   :  { %v1588_v54 = vadd.f32 %v1587_v41, %v2475_v43 }
 0x942   :  { %v1590_v25 = vmax.f32 %v1588_v54, 0.0 }
 0x944   :  { %1777 = vmatmul.msk.f32.vlgmr.msrb.gmra.mxu1 %vm837_vm14, %v1590_v25 }
 0x9c1   :  { %v1611_v39 = vpop.f32.mrf.mxu1 }
 0x9c2   :  { %v1612_v56 = vadd.f32 %v1611_v39, %v866_v9 }
 0x9c4   :  { %v1615_v17 = vrot.slane %v1612_v56, 7 }
 0x9c6   :  { %v1617_v40 = vsel %vm377_vm5, %v888_v16, %v1615_v17 }
 0x9c7   :  { %1619 = vst.msk [vmem:[#allocation2] sm:$0x3] %vm1618_vm15, %v1617_v40 }
 0x9c8   :  { %1630 = dma.vmem_to_hbm [thread:$0]  %s1626_s1, 32, %s1628_s26, [#allocation3]  }
 0x9c9   :  { %1807 = dma.done.wait [#allocation3], 32  }
 0x9ca   :  { %1808 = vsyncadd [#allocation3], 4294967264 }
 0x9cb   :  { %1635 = vsyncpa [#allocation3], 1 }

</bundles_post_ra>
